<compile_context>
chip_gen: v7x
topology: tpu7x:2x2x1
jax: 0.10.0
libtpu: 0.0.40
codegen_flags: <defaults>
</compile_context>

<pallas_src>
import functools

import jax
import jax.numpy as jnp
from jax.experimental import pallas as pl
from jax.experimental.pallas import tpu as pltpu


_BLOCK_PARAM_ORDER = ('pos_w', 'pos_b', 'centers', 'log_scales',
                      'val_w', 'val_b', 'out_w', 'out_b',
                      'ln1_w', 'ln1_b',
                      'ff_w1', 'ff_b1', 'ff_w2', 'ff_b2',
                      'ln2_w', 'ln2_b')


# ------------------------------ VMEM budgeting --------------------------------

def _vmem_cap():
    try:
        cap = int(pltpu.get_tpu_info().vmem_capacity_bytes)
    except Exception:
        cap = 64 << 20                      # conservative (v7x per-TC VMEM)
    return (cap * 3) // 4


def _vmem_limit_bytes(need_bytes):
    return int(min(max(int(need_bytes), 16 << 20), _vmem_cap()))


# ----------------------------- in-kernel helpers -------------------------------

def _layernorm2d(h, w, b, eps=1e-5):
    # h: [N, D] f32, w/b: [1, D] f32
    mu = jnp.mean(h, axis=-1, keepdims=True)
    var = jnp.mean((h - mu) ** 2, axis=-1, keepdims=True)
    return (h - mu) * jax.lax.rsqrt(var + eps) * w + b


def _gelu(x):
    c = 0.7978845608028654  # sqrt(2/pi)
    return 0.5 * x * (1.0 + jnp.tanh(c * (x + 0.044715 * x * x * x)))


# --------------------------- fused transformer stack ---------------------------
# grid = (B, L): one batch element per program, all layers run sequentially on
# the VMEM-resident residual stream (res_ref scratch); per-layer weights stream
# (and double-buffer) over the "arbitrary" L axis.

def fused_layers_kernel(x_ref,
                        posw_ref, posb_ref, cen_ref, logs_ref,
                        valw_ref, valb_ref, outw_ref, outb_ref,
                        ln1w_ref, ln1b_ref,
                        w1_ref, b1_ref, w2_ref, b2_ref,
                        ln2w_ref, ln2b_ref,
                        o_ref, res_ref, *, num_splats):
    l = pl.program_id(1)

    @pl.when(l == 0)
    def _():
        res_ref[...] = x_ref[...]           # load residual stream once per batch elem

    x = res_ref[0]                          # [T, D] f32
    xb = x.astype(jnp.bfloat16)

    # ---- splat-flow attention: projections (bf16 MXU, f32 accumulate) ----
    e = jnp.dot(xb, posw_ref[0], preferred_element_type=jnp.float32) + posb_ref[0]   # [T, Ep]
    v = jnp.dot(xb, valw_ref[0], preferred_element_type=jnp.float32) + valb_ref[0]   # [T, D]

    centers = cen_ref[0]                                            # [Kp, Ep] f32
    scales = jnp.clip(jnp.exp(logs_ref[0]), 0.1, 2.0)               # [1, Kp]
    inv_var = 1.0 / (scales * scales)

    # ---- all-pairs Gaussian affinity in one MXU matmul ----
    #   |e - c|^2 = |e|^2 - 2 e.c + |c|^2
    e_sq = jnp.sum(e * e, axis=-1, keepdims=True)                   # [T, 1]
    ones_row = jnp.ones((1, centers.shape[1]), jnp.float32)
    c_sq = jax.lax.dot_general(ones_row, centers * centers,
                               dimension_numbers=(((1,), (1,)), ((), ())),
                               preferred_element_type=jnp.float32)  # [1, Kp]
    ec = jax.lax.dot_general(e, centers,
                             dimension_numbers=(((1,), (1,)), ((), ())),
                             preferred_element_type=jnp.float32)    # [T, Kp]
    d2 = e_sq - 2.0 * ec + c_sq
    aff = jnp.exp(-0.5 * d2 * inv_var)                              # [T, Kp]
    lane = jax.lax.broadcasted_iota(jnp.int32, aff.shape, 1)
    aff = jnp.where(lane < num_splats, aff, 0.0)                    # mask K padding (exact)

    norm = jnp.sum(aff, axis=-1, keepdims=True)                     # [T, 1]
    wmat = aff * pl.reciprocal(norm + 1e-8, approx=True)            # [T, Kp]

    # ---- tokens -> splats -> tokens as two MXU matmuls ----
    wb = wmat.astype(jnp.bfloat16)
    splat = jax.lax.dot_general(wb, v.astype(jnp.bfloat16),
                                dimension_numbers=(((0,), (0,)), ((), ())),
                                preferred_element_type=jnp.float32)  # [Kp, D]
    tok = jnp.dot(wb, splat.astype(jnp.bfloat16),
                  preferred_element_type=jnp.float32)                # [T, D]

    attn = jnp.dot(tok.astype(jnp.bfloat16), outw_ref[0],
                   preferred_element_type=jnp.float32) + outb_ref[0]

    # ---- residual + LayerNorm 1 (f32) ----
    h = _layernorm2d(x + attn, ln1w_ref[0], ln1b_ref[0])

    # ---- feed-forward (bf16 MXU operands, f32 accumulate / elementwise) ----
    f = _gelu(jnp.dot(h.astype(jnp.bfloat16), w1_ref[0],
                      preferred_element_type=jnp.float32) + b1_ref[0])
    f = jnp.dot(f.astype(jnp.bfloat16), w2_ref[0],
                preferred_element_type=jnp.float32) + b2_ref[0]

    # ---- residual + LayerNorm 2; keep stream resident, flush at last layer ----
    y = _layernorm2d(h + f, ln2w_ref[0], ln2b_ref[0])
    res_ref[0] = y

    @pl.when(l == pl.num_programs(1) - 1)
    def _():
        o_ref[0] = y


def fused_splat_layers(x, layers, num_splats):
    B, T, D = x.shape
    L = int(layers['pos_w'].shape[0])
    weights = [layers[k] for k in _BLOCK_PARAM_ORDER]

    x_spec = pl.BlockSpec((1, T, D), lambda b, l: (b, 0, 0))
    w_specs = [pl.BlockSpec((1,) + tuple(int(s) for s in w.shape[1:]),
                            lambda b, l: (l, 0, 0)) for w in weights]
    out_spec = pl.BlockSpec((1, T, D), lambda b, l: (b, 0, 0))

    per_layer_w = sum(int(w.size) * w.dtype.itemsize for w in weights) // L
    hid = int(layers['ff_w1'].shape[2])
    need = (2 * per_layer_w            # streaming weights, double-buffered over L
            + 4 * T * D * 4            # x + out blocks (double-buffered)
            + T * D * 4                # resident residual-stream scratch
            + 2 * T * hid * 4          # FF hidden intermediates
            + (8 << 20))

    kernel = functools.partial(fused_layers_kernel, num_splats=num_splats)
    return pl.pallas_call(
        kernel,
        out_shape=jax.ShapeDtypeStruct(x.shape, jnp.float32),
        grid=(B, L),
        in_specs=[x_spec] + w_specs,
        out_specs=out_spec,
        scratch_shapes=[pltpu.VMEM((1, T, D), jnp.float32)],
        compiler_params=pltpu.CompilerParams(
            dimension_semantics=("parallel", "arbitrary"),
            vmem_limit_bytes=_vmem_limit_bytes(need)),
    )(x, *weights)


# ------------------------ final norm + tied projection -------------------------
# LN(x tile) is computed once per token tile (hoisted out of the vocab loop via
# a bf16 VMEM scratch); each vocab step is just one MXU matmul over D.

def final_kernel(x_ref, lnw_ref, lnb_ref, emb_ref, o_ref, h_ref):
    @pl.when(pl.program_id(1) == 0)
    def _():
        h = _layernorm2d(x_ref[...], lnw_ref[...], lnb_ref[...])
        h_ref[...] = h.astype(jnp.bfloat16)

    o_ref[...] = jax.lax.dot_general(
        h_ref[...], emb_ref[...],
        dimension_numbers=(((1,), (1,)), ((), ())),
        preferred_element_type=jnp.float32)


def _vocab_tile(v_pad):
    for t in (512, 256, 128):
        if v_pad % t == 0:
            return t
    return v_pad


def _token_tile(n, d, tn, cap):
    def est(t):
        return 2 * t * d * 4 + t * d * 2 + 2 * tn * d * 2 + 2 * t * tn * 4 + (2 << 20)
    if est(n) <= cap:
        return n                               # whole token axis in one tile
    cands = [t for t in (4096, 2048, 1024, 512, 256, 128, 64, 32, 16, 8)
             if t < n and n % t == 0]
    for t in cands:
        if est(t) <= cap:
            return t
    return cands[-1] if cands else n


def final_proj(x2, ln_w, ln_b, emb_pad):
    N, D = x2.shape
    Vp = int(emb_pad.shape[0])
    tn = _vocab_tile(Vp)
    cap = _vmem_cap()
    tm = _token_tile(N, D, tn, cap)

    need = 2 * tm * D * 4 + tm * D * 2 + 2 * tn * D * 2 + 2 * tm * tn * 4 + (2 << 20)
    return pl.pallas_call(
        final_kernel,
        out_shape=jax.ShapeDtypeStruct((N, Vp), jnp.float32),
        grid=(N // tm, Vp // tn),
        in_specs=[pl.BlockSpec((tm, D), lambda i, j: (i, 0)),
                  pl.BlockSpec((1, D), lambda i, j: (0, 0)),
                  pl.BlockSpec((1, D), lambda i, j: (0, 0)),
                  pl.BlockSpec((tn, D), lambda i, j: (j, 0))],
        out_specs=pl.BlockSpec((tm, tn), lambda i, j: (i, j)),
        scratch_shapes=[pltpu.VMEM((tm, D), jnp.bfloat16)],
        compiler_params=pltpu.CompilerParams(
            dimension_semantics=("parallel", "arbitrary"),
            vmem_limit_bytes=_vmem_limit_bytes(need)),
    )(x2, ln_w, ln_b, emb_pad)


# ------------------------------ parameter init ---------------------------------

def init_params(key, vocab_size, model_dim, num_layers, max_seq_len, splats):
    D = model_dim
    E = min(128, D // 2)
    Ep = 128                      # splat embedding dim padded to a full lane width
    Kp = 128                      # splat axis padded for MXU-friendly [T, K] tiles
    V_pad = ((vocab_size + 127) // 128) * 128

    keys = iter(jax.random.split(key, 2 + num_layers * 6))

    def nrm(shape, std=0.02):
        return std * jax.random.normal(next(keys), shape, jnp.float32)

    tok = nrm((vocab_size, D))
    tok = jnp.pad(tok, ((0, V_pad - vocab_size), (0, 0))).astype(jnp.bfloat16)

    per_layer = []
    for _ in range(num_layers):
        pos_w = jnp.pad(nrm((D, E)), ((0, 0), (0, Ep - E)))
        centers = jnp.pad(
            0.5 * jax.random.normal(next(keys), (splats, E), jnp.float32),
            ((0, Kp - splats), (0, Ep - E)))
        lp = dict(
            pos_w=pos_w.astype(jnp.bfloat16),
            pos_b=jnp.zeros((1, Ep), jnp.float32),
            centers=centers,
            log_scales=jnp.zeros((1, Kp), jnp.float32),
            val_w=nrm((D, D)).astype(jnp.bfloat16),
            val_b=jnp.zeros((1, D), jnp.float32),
            out_w=nrm((D, D)).astype(jnp.bfloat16),
            out_b=jnp.zeros((1, D), jnp.float32),
            ln1_w=jnp.ones((1, D), jnp.float32),
            ln1_b=jnp.zeros((1, D), jnp.float32),
            ff_w1=nrm((D, 4 * D)).astype(jnp.bfloat16),
            ff_b1=jnp.zeros((1, 4 * D), jnp.float32),
            ff_w2=nrm((4 * D, D)).astype(jnp.bfloat16),
            ff_b2=jnp.zeros((1, D), jnp.float32),
            ln2_w=jnp.ones((1, D), jnp.float32),
            ln2_b=jnp.zeros((1, D), jnp.float32),
        )
        per_layer.append(lp)

    layers = {k: jnp.stack([lp[k] for lp in per_layer], axis=0)
              for k in _BLOCK_PARAM_ORDER}

    return {
        'tok_emb': tok,                              # [V_pad, D] bf16 (tied proj)
        'pos_emb': nrm((max_seq_len, D)),            # f32
        'final_ln_w': jnp.ones((1, D), jnp.float32),
        'final_ln_b': jnp.zeros((1, D), jnp.float32),
        'layers': layers,                            # stacked [L, ...] weights
    }


# ---------------------------------- forward ------------------------------------

@functools.partial(jax.jit, static_argnames=('vocab_size', 'num_splats'))
def splatflow_gpt_forward(params, input_ids, *, vocab_size, num_splats):
    B, T = input_ids.shape
    D = params['pos_emb'].shape[1]

    # glue: embedding gathers + positional embedding (dropout = identity, eval)
    tok = jnp.take(params['tok_emb'], input_ids, axis=0).astype(jnp.float32)
    pos = params['pos_emb'][:T][None, :, :]
    x = tok + pos                                    # [B, T, D] f32

    x = fused_splat_layers(x, params['layers'], num_splats)

    x2 = x.reshape(B * T, D)
    logits_pad = final_proj(x2, params['final_ln_w'], params['final_ln_b'],
                            params['tok_emb'])       # [B*T, V_pad]
    Vp = logits_pad.shape[1]
    return logits_pad.reshape(B, T, Vp)[:, :, :vocab_size]


# ------------------------------------ main --------------------------------------

if __name__ == "__main__":
    vocab_size = 64
    model_dim = 32
    num_layers = 2
    max_seq_len = 16
    splats_per_layer = 4
    B, T = 2, 8

    key = jax.random.PRNGKey(0)
    pkey, dkey = jax.random.split(key)
    params = init_params(pkey, vocab_size, model_dim, num_layers,
                         max_seq_len, splats_per_layer)
    input_ids = jax.random.randint(dkey, (B, T), 0, vocab_size, dtype=jnp.int32)

    logits = splatflow_gpt_forward(params, input_ids, vocab_size=vocab_size,
                                   num_splats=splats_per_layer)
    jax.block_until_ready(logits)

    assert logits.shape == (B, T, vocab_size), logits.shape
    assert bool(jnp.all(jnp.isfinite(logits)))
    print("KERNEL_OK")
</pallas_src>

<mosaic_0001>
module attributes {stable_mosaic.version = 11 : i64} {
  func.func @final_kernel(%arg0: i32, %arg1: i32, %arg2: memref<16x32xf32, #tpu.memory_space<vmem>>, %arg3: memref<1x32xf32, #tpu.memory_space<vmem>>, %arg4: memref<1x32xf32, #tpu.memory_space<vmem>>, %arg5: memref<128x32xbf16, #tpu.memory_space<vmem>>, %arg6: memref<16x128xf32, #tpu.memory_space<vmem>>, %arg7: memref<16x32xbf16, #tpu.memory_space<vmem>>) attributes {dimension_semantics = [#tpu.dimension_semantics<parallel>, #tpu.dimension_semantics<arbitrary>], iteration_bounds = array<i64: 1, 1>, scalar_prefetch = 0 : i64, scratch_operands = 1 : i64, tpu.core_type = #tpu.core_type<tc>, window_params = [{transform_indices = @transform_0, window_bounds = array<i64: 16, 32>}, {pipeline_mode = #tpu.pipeline_mode<synchronous>, transform_indices = @transform_1, window_bounds = array<i64: 1, 32>}, {pipeline_mode = #tpu.pipeline_mode<synchronous>, transform_indices = @transform_2, window_bounds = array<i64: 1, 32>}, {transform_indices = @transform_3, window_bounds = array<i64: 128, 32>}, {transform_indices = @transform_4, window_bounds = array<i64: 16, 128>}]} {
    %c0_i32 = arith.constant 0 : i32
    %0 = arith.cmpi eq, %arg1, %c0_i32 : i32
    %1 = arith.extui %0 : i1 to i32
    %c0_i32_0 = arith.constant 0 : i32
    %2 = arith.cmpi ne, %1, %c0_i32_0 : i32
    scf.if %2 {
      %c0_6 = arith.constant 0 : index
      %c0_7 = arith.constant 0 : index
      %7 = vector.load %arg2[%c0_6, %c0_7] : memref<16x32xf32, #tpu.memory_space<vmem>>, vector<16x32xf32>
      %c0_8 = arith.constant 0 : index
      %c0_9 = arith.constant 0 : index
      %8 = vector.load %arg3[%c0_8, %c0_9] : memref<1x32xf32, #tpu.memory_space<vmem>>, vector<1x32xf32>
      %c0_10 = arith.constant 0 : index
      %c0_11 = arith.constant 0 : index
      %9 = vector.load %arg4[%c0_10, %c0_11] : memref<1x32xf32, #tpu.memory_space<vmem>>, vector<1x32xf32>
      %cst_12 = arith.constant dense<0.000000e+00> : vector<16xf32>
      %10 = vector.multi_reduction <add>, %7, %cst_12 [1] : vector<16x32xf32> to vector<16xf32>
      %11 = vector.shape_cast %10 : vector<16xf32> to vector<16x1xf32>
      %cst_13 = arith.constant 3.200000e+01 : f32
      %12 = vector.broadcast %cst_13 : f32 to vector<16x1xf32>
      %13 = arith.divf %11, %12 : vector<16x1xf32>
      %14 = vector.broadcast %13 : vector<16x1xf32> to vector<16x32xf32>
      %15 = arith.subf %7, %14 : vector<16x32xf32>
      %16 = arith.mulf %15, %15 : vector<16x32xf32>
      %cst_14 = arith.constant dense<0.000000e+00> : vector<16xf32>
      %17 = vector.multi_reduction <add>, %16, %cst_14 [1] : vector<16x32xf32> to vector<16xf32>
      %18 = vector.shape_cast %17 : vector<16xf32> to vector<16x1xf32>
      %cst_15 = arith.constant 3.200000e+01 : f32
      %19 = vector.broadcast %cst_15 : f32 to vector<16x1xf32>
      %20 = arith.divf %18, %19 : vector<16x1xf32>
      %21 = vector.broadcast %13 : vector<16x1xf32> to vector<16x32xf32>
      %22 = arith.subf %7, %21 : vector<16x32xf32>
      %cst_16 = arith.constant 9.99999974E-6 : f32
      %23 = vector.broadcast %cst_16 : f32 to vector<16x1xf32>
      %24 = arith.addf %20, %23 : vector<16x1xf32>
      %25 = math.rsqrt %24 : vector<16x1xf32>
      %26 = vector.broadcast %25 : vector<16x1xf32> to vector<16x32xf32>
      %27 = arith.mulf %22, %26 : vector<16x32xf32>
      %28 = vector.broadcast %8 : vector<1x32xf32> to vector<16x32xf32>
      %29 = arith.mulf %27, %28 : vector<16x32xf32>
      %30 = vector.broadcast %9 : vector<1x32xf32> to vector<16x32xf32>
      %31 = arith.addf %29, %30 : vector<16x32xf32>
      %32 = arith.truncf %31 : vector<16x32xf32> to vector<16x32xbf16>
      %c0_17 = arith.constant 0 : index
      %c0_18 = arith.constant 0 : index
      %33 = vector.load %arg7[%c0_17, %c0_18] : memref<16x32xbf16, #tpu.memory_space<vmem>>, vector<16x32xbf16>
      tpu.vector_store %arg7[%c0_17, %c0_18], %32 {strides = array<i32>} : memref<16x32xbf16, #tpu.memory_space<vmem>>, vector<16x32xbf16>,
    } else {
    }
    %c0 = arith.constant 0 : index
    %c0_1 = arith.constant 0 : index
    %3 = vector.load %arg7[%c0, %c0_1] : memref<16x32xbf16, #tpu.memory_space<vmem>>, vector<16x32xbf16>
    %c0_2 = arith.constant 0 : index
    %c0_3 = arith.constant 0 : index
    %4 = vector.load %arg5[%c0_2, %c0_3] : memref<128x32xbf16, #tpu.memory_space<vmem>>, vector<128x32xbf16>
    %cst = arith.constant dense<0.000000e+00> : vector<16x128xf32>
    %5 = tpu.matmul %3, %4, %cst {dimension_numbers = #tpu.dot_dimension_numbers<[1], [1], [0], [0], [0, 0, 1, 0], [], []>} : vector<16x32xbf16>, vector<128x32xbf16>, vector<16x128xf32> -> vector<16x128xf32>
    %c0_4 = arith.constant 0 : index
    %c0_5 = arith.constant 0 : index
    %6 = vector.load %arg6[%c0_4, %c0_5] : memref<16x128xf32, #tpu.memory_space<vmem>>, vector<16x128xf32>
    tpu.vector_store %arg6[%c0_4, %c0_5], %5 {strides = array<i32>} : memref<16x128xf32, #tpu.memory_space<vmem>>, vector<16x128xf32>,
    return
  }
  func.func @transform_0(%arg0: i32, %arg1: i32) -> (i32, i32) {
    %c0_i32 = arith.constant 0 : i32
    %c0_i32_0 = arith.constant 0 : i32
    return %arg0, %c0_i32 : i32, i32
  }
  func.func @transform_1(%arg0: i32, %arg1: i32) -> (i32, i32) {
    %c0_i32 = arith.constant 0 : i32
    %c0_i32_0 = arith.constant 0 : i32
    %c0_i32_1 = arith.constant 0 : i32
    return %c0_i32, %c0_i32_0 : i32, i32
  }
  func.func @transform_2(%arg0: i32, %arg1: i32) -> (i32, i32) {
    %c0_i32 = arith.constant 0 : i32
    %c0_i32_0 = arith.constant 0 : i32
    %c0_i32_1 = arith.constant 0 : i32
    return %c0_i32, %c0_i32_0 : i32, i32
  }
  func.func @transform_3(%arg0: i32, %arg1: i32) -> (i32, i32) {
    %c0_i32 = arith.constant 0 : i32
    %c0_i32_0 = arith.constant 0 : i32
    return %arg1, %c0_i32 : i32, i32
  }
  func.func @transform_4(%arg0: i32, %arg1: i32) -> (i32, i32) {
    %c0_i32 = arith.constant 0 : i32
    return %arg0, %arg1 : i32, i32
  }
}

module attributes {stable_mosaic.version = 11 : i64} {
  func.func @fused_layers_kernel(%arg0: i32, %arg1: i32, %arg2: memref<1x8x32xf32, #tpu.memory_space<vmem>>, %arg3: memref<1x32x128xbf16, #tpu.memory_space<vmem>>, %arg4: memref<1x1x128xf32, #tpu.memory_space<vmem>>, %arg5: memref<1x128x128xf32, #tpu.memory_space<vmem>>, %arg6: memref<1x1x128xf32, #tpu.memory_space<vmem>>, %arg7: memref<1x32x32xbf16, #tpu.memory_space<vmem>>, %arg8: memref<1x1x32xf32, #tpu.memory_space<vmem>>, %arg9: memref<1x32x32xbf16, #tpu.memory_space<vmem>>, %arg10: memref<1x1x32xf32, #tpu.memory_space<vmem>>, %arg11: memref<1x1x32xf32, #tpu.memory_space<vmem>>, %arg12: memref<1x1x32xf32, #tpu.memory_space<vmem>>, %arg13: memref<1x32x128xbf16, #tpu.memory_space<vmem>>, %arg14: memref<1x1x128xf32, #tpu.memory_space<vmem>>, %arg15: memref<1x128x32xbf16, #tpu.memory_space<vmem>>, %arg16: memref<1x1x32xf32, #tpu.memory_space<vmem>>, %arg17: memref<1x1x32xf32, #tpu.memory_space<vmem>>, %arg18: memref<1x1x32xf32, #tpu.memory_space<vmem>>, %arg19: memref<1x8x32xf32, #tpu.memory_space<vmem>>, %arg20: memref<1x8x32xf32, #tpu.memory_space<vmem>>) attributes {dimension_semantics = [#tpu.dimension_semantics<parallel>, #tpu.dimension_semantics<arbitrary>], iteration_bounds = array<i64: 2, 2>, scalar_prefetch = 0 : i64, scratch_operands = 1 : i64, tpu.core_type = #tpu.core_type<tc>, window_params = [{transform_indices = @transform_0, window_bounds = array<i64: 1, 8, 32>}, {transform_indices = @transform_1, window_bounds = array<i64: 1, 32, 128>}, {transform_indices = @transform_2, window_bounds = array<i64: 1, 1, 128>}, {transform_indices = @transform_3, window_bounds = array<i64: 1, 128, 128>}, {transform_indices = @transform_4, window_bounds = array<i64: 1, 1, 128>}, {transform_indices = @transform_5, window_bounds = array<i64: 1, 32, 32>}, {transform_indices = @transform_6, window_bounds = array<i64: 1, 1, 32>}, {transform_indices = @transform_7, window_bounds = array<i64: 1, 32, 32>}, {transform_indices = @transform_8, window_bounds = array<i64: 1, 1, 32>}, {transform_indices = @transform_9, window_bounds = array<i64: 1, 1, 32>}, {transform_indices = @transform_10, window_bounds = array<i64: 1, 1, 32>}, {transform_indices = @transform_11, window_bounds = array<i64: 1, 32, 128>}, {transform_indices = @transform_12, window_bounds = array<i64: 1, 1, 128>}, {transform_indices = @transform_13, window_bounds = array<i64: 1, 128, 32>}, {transform_indices = @transform_14, window_bounds = array<i64: 1, 1, 32>}, {transform_indices = @transform_15, window_bounds = array<i64: 1, 1, 32>}, {transform_indices = @transform_16, window_bounds = array<i64: 1, 1, 32>}, {transform_indices = @transform_17, window_bounds = array<i64: 1, 8, 32>}]} {
    %c0_i32 = arith.constant 0 : i32
    %0 = arith.cmpi eq, %arg1, %c0_i32 : i32
    %1 = arith.extui %0 : i1 to i32
    %c0_i32_0 = arith.constant 0 : i32
    %2 = arith.cmpi ne, %1, %c0_i32_0 : i32
    scf.if %2 {
      %c0_87 = arith.constant 0 : index
      %c0_88 = arith.constant 0 : index
      %c0_89 = arith.constant 0 : index
      %164 = vector.load %arg2[%c0_87, %c0_88, %c0_89] : memref<1x8x32xf32, #tpu.memory_space<vmem>>, vector<1x8x32xf32>
      %c0_90 = arith.constant 0 : index
      %c0_91 = arith.constant 0 : index
      %c0_92 = arith.constant 0 : index
      %165 = vector.load %arg20[%c0_90, %c0_91, %c0_92] : memref<1x8x32xf32, #tpu.memory_space<vmem>>, vector<1x8x32xf32>
      tpu.vector_store %arg20[%c0_90, %c0_91, %c0_92], %164 {strides = array<i32>} : memref<1x8x32xf32, #tpu.memory_space<vmem>>, vector<1x8x32xf32>,
    } else {
    }
    %c0 = arith.constant 0 : index
    %c0_1 = arith.constant 0 : index
    %c0_2 = arith.constant 0 : index
    %3 = vector.load %arg20[%c0, %c0_1, %c0_2] : memref<1x8x32xf32, #tpu.memory_space<vmem>>, vector<1x8x32xf32>
    %4 = vector.shape_cast %3 : vector<1x8x32xf32> to vector<8x32xf32>
    %5 = arith.truncf %4 : vector<8x32xf32> to vector<8x32xbf16>
    %c0_3 = arith.constant 0 : index
    %c0_4 = arith.constant 0 : index
    %c0_5 = arith.constant 0 : index
    %6 = vector.load %arg3[%c0_3, %c0_4, %c0_5] : memref<1x32x128xbf16, #tpu.memory_space<vmem>>, vector<1x32x128xbf16>
    %7 = vector.shape_cast %6 : vector<1x32x128xbf16> to vector<32x128xbf16>
    %cst = arith.constant dense<0.000000e+00> : vector<8x128xf32>
    %8 = tpu.matmul %5, %7, %cst {dimension_numbers = #tpu.dot_dimension_numbers<[1], [0], [0], [1], [0, 0, 1, 1], [], []>} : vector<8x32xbf16>, vector<32x128xbf16>, vector<8x128xf32> -> vector<8x128xf32>
    %c0_6 = arith.constant 0 : index
    %c0_7 = arith.constant 0 : index
    %c0_8 = arith.constant 0 : index
    %9 = vector.load %arg4[%c0_6, %c0_7, %c0_8] : memref<1x1x128xf32, #tpu.memory_space<vmem>>, vector<1x1x128xf32>
    %10 = vector.shape_cast %9 : vector<1x1x128xf32> to vector<1x128xf32>
    %11 = vector.broadcast %10 : vector<1x128xf32> to vector<8x128xf32>
    %12 = arith.addf %8, %11 : vector<8x128xf32>
    %c0_9 = arith.constant 0 : index
    %c0_10 = arith.constant 0 : index
    %c0_11 = arith.constant 0 : index
    %13 = vector.load %arg7[%c0_9, %c0_10, %c0_11] : memref<1x32x32xbf16, #tpu.memory_space<vmem>>, vector<1x32x32xbf16>
    %14 = vector.shape_cast %13 : vector<1x32x32xbf16> to vector<32x32xbf16>
    %cst_12 = arith.constant dense<0.000000e+00> : vector<8x32xf32>
    %15 = tpu.matmul %5, %14, %cst_12 {dimension_numbers = #tpu.dot_dimension_numbers<[1], [0], [0], [1], [0, 0, 1, 1], [], []>} : vector<8x32xbf16>, vector<32x32xbf16>, vector<8x32xf32> -> vector<8x32xf32>
    %c0_13 = arith.constant 0 : index
    %c0_14 = arith.constant 0 : index
    %c0_15 = arith.constant 0 : index
    %16 = vector.load %arg8[%c0_13, %c0_14, %c0_15] : memref<1x1x32xf32, #tpu.memory_space<vmem>>, vector<1x1x32xf32>
    %17 = vector.shape_cast %16 : vector<1x1x32xf32> to vector<1x32xf32>
    %18 = vector.broadcast %17 : vector<1x32xf32> to vector<8x32xf32>
    %19 = arith.addf %15, %18 : vector<8x32xf32>
    %c0_16 = arith.constant 0 : index
    %c0_17 = arith.constant 0 : index
    %c0_18 = arith.constant 0 : index
    %20 = vector.load %arg5[%c0_16, %c0_17, %c0_18] : memref<1x128x128xf32, #tpu.memory_space<vmem>>, vector<1x128x128xf32>
    %21 = vector.shape_cast %20 : vector<1x128x128xf32> to vector<128x128xf32>
    %c0_19 = arith.constant 0 : index
    %c0_20 = arith.constant 0 : index
    %c0_21 = arith.constant 0 : index
    %22 = vector.load %arg6[%c0_19, %c0_20, %c0_21] : memref<1x1x128xf32, #tpu.memory_space<vmem>>, vector<1x1x128xf32>
    %23 = vector.shape_cast %22 : vector<1x1x128xf32> to vector<1x128xf32>
    %24 = math.exp %23 : vector<1x128xf32>
    %cst_22 = arith.constant 1.000000e-01 : f32
    %cst_23 = arith.constant 2.000000e+00 : f32
    %25 = vector.broadcast %cst_22 : f32 to vector<1x128xf32>
    %26 = arith.maximumf %25, %24 : vector<1x128xf32>
    %27 = vector.broadcast %cst_23 : f32 to vector<1x128xf32>
    %28 = arith.minimumf %27, %26 : vector<1x128xf32>
    %29 = arith.mulf %28, %28 : vector<1x128xf32>
    %cst_24 = arith.constant 1.000000e+00 : f32
    %30 = vector.broadcast %cst_24 : f32 to vector<1x128xf32>
    %31 = arith.divf %30, %29 : vector<1x128xf32>
    %32 = arith.mulf %12, %12 : vector<8x128xf32>
    %cst_25 = arith.constant dense<0.000000e+00> : vector<8xf32>
    %33 = vector.multi_reduction <add>, %32, %cst_25 [1] : vector<8x128xf32> to vector<8xf32>
    %34 = vector.shape_cast %33 : vector<8xf32> to vector<8x1xf32>
    %cst_26 = arith.constant 1.000000e+00 : f32
    %35 = vector.broadcast %cst_26 : f32 to vector<1x128xf32>
    %36 = arith.mulf %21, %21 : vector<128x128xf32>
    %cst_27 = arith.constant dense<0.000000e+00> : vector<1x128xf32>
    %37 = tpu.matmul %35, %36, %cst_27 {dimension_numbers = #tpu.dot_dimension_numbers<[1], [1], [0], [0], [0, 0, 1, 0], [], []>} : vector<1x128xf32>, vector<128x128xf32>, vector<1x128xf32> -> vector<1x128xf32>
    %cst_28 = arith.constant dense<0.000000e+00> : vector<8x128xf32>
    %38 = tpu.matmul %12, %21, %cst_28 {dimension_numbers = #tpu.dot_dimension_numbers<[1], [1], [0], [0], [0, 0, 1, 0], [], []>} : vector<8x128xf32>, vector<128x128xf32>, vector<8x128xf32> -> vector<8x128xf32>
    %cst_29 = arith.constant 2.000000e+00 : f32
    %39 = vector.broadcast %cst_29 : f32 to vector<8x128xf32>
    %40 = arith.mulf %39, %38 : vector<8x128xf32>
    %41 = vector.broadcast %34 : vector<8x1xf32> to vector<8x128xf32>
    %42 = arith.subf %41, %40 : vector<8x128xf32>
    %43 = vector.broadcast %37 : vector<1x128xf32> to vector<8x128xf32>
    %44 = arith.addf %42, %43 : vector<8x128xf32>
    %cst_30 = arith.constant -5.000000e-01 : f32
    %45 = vector.broadcast %cst_30 : f32 to vector<8x128xf32>
    %46 = arith.mulf %45, %44 : vector<8x128xf32>
    %47 = vector.broadcast %31 : vector<1x128xf32> to vector<8x128xf32>
    %48 = arith.mulf %46, %47 : vector<8x128xf32>
    %49 = math.exp %48 : vector<8x128xf32>
    %50 = tpu.iota {dimensions = array<i32: 1>} : vector<8x128xi32>
    %c4_i32 = arith.constant 4 : i32
    %51 = vector.broadcast %c4_i32 : i32 to vector<8x128xi32>
    %52 = arith.cmpi slt, %50, %51 : vector<8x128xi32>
    %cst_31 = arith.constant 0.000000e+00 : f32
    %53 = vector.broadcast %cst_31 : f32 to vector<8x128xf32>
    %54 = arith.select %52, %49, %53 : vector<8x128xi1>, vector<8x128xf32>
    %cst_32 = arith.constant dense<0.000000e+00> : vector<8xf32>
    %55 = vector.multi_reduction <add>, %54, %cst_32 [1] : vector<8x128xf32> to vector<8xf32>
    %56 = vector.shape_cast %55 : vector<8xf32> to vector<8x1xf32>
    %cst_33 = arith.constant 9.99999993E-9 : f32
    %57 = vector.broadcast %cst_33 : f32 to vector<8x1xf32>
    %58 = arith.addf %56, %57 : vector<8x1xf32>
    %59 = tpu.reciprocal %58 {approx = true} : vector<8x1xf32> -> vector<8x1xf32>
    %60 = vector.broadcast %59 : vector<8x1xf32> to vector<8x128xf32>
    %61 = arith.mulf %54, %60 : vector<8x128xf32>
    %62 = arith.truncf %61 : vector<8x128xf32> to vector<8x128xbf16>
    %63 = arith.truncf %19 : vector<8x32xf32> to vector<8x32xbf16>
    %cst_34 = arith.constant dense<0.000000e+00> : vector<128x32xf32>
    %64 = tpu.matmul %62, %63, %cst_34 {dimension_numbers = #tpu.dot_dimension_numbers<[0], [0], [1], [1], [0, 1, 1, 1], [], []>} : vector<8x128xbf16>, vector<8x32xbf16>, vector<128x32xf32> -> vector<128x32xf32>
    %65 = arith.truncf %64 : vector<128x32xf32> to vector<128x32xbf16>
    %cst_35 = arith.constant dense<0.000000e+00> : vector<8x32xf32>
    %66 = tpu.matmul %62, %65, %cst_35 {dimension_numbers = #tpu.dot_dimension_numbers<[1], [0], [0], [1], [0, 0, 1, 1], [], []>} : vector<8x128xbf16>, vector<128x32xbf16>, vector<8x32xf32> -> vector<8x32xf32>
    %67 = arith.truncf %66 : vector<8x32xf32> to vector<8x32xbf16>
    %c0_36 = arith.constant 0 : index
    %c0_37 = arith.constant 0 : index
    %c0_38 = arith.constant 0 : index
    %68 = vector.load %arg9[%c0_36, %c0_37, %c0_38] : memref<1x32x32xbf16, #tpu.memory_space<vmem>>, vector<1x32x32xbf16>
    %69 = vector.shape_cast %68 : vector<1x32x32xbf16> to vector<32x32xbf16>
    %cst_39 = arith.constant dense<0.000000e+00> : vector<8x32xf32>
    %70 = tpu.matmul %67, %69, %cst_39 {dimension_numbers = #tpu.dot_dimension_numbers<[1], [0], [0], [1], [0, 0, 1, 1], [], []>} : vector<8x32xbf16>, vector<32x32xbf16>, vector<8x32xf32> -> vector<8x32xf32>
    %c0_40 = arith.constant 0 : index
    %c0_41 = arith.constant 0 : index
    %c0_42 = arith.constant 0 : index
    %71 = vector.load %arg10[%c0_40, %c0_41, %c0_42] : memref<1x1x32xf32, #tpu.memory_space<vmem>>, vector<1x1x32xf32>
    %72 = vector.shape_cast %71 : vector<1x1x32xf32> to vector<1x32xf32>
    %73 = vector.broadcast %72 : vector<1x32xf32> to vector<8x32xf32>
    %74 = arith.addf %70, %73 : vector<8x32xf32>
    %75 = arith.addf %4, %74 : vector<8x32xf32>
    %c0_43 = arith.constant 0 : index
    %c0_44 = arith.constant 0 : index
    %c0_45 = arith.constant 0 : index
    %76 = vector.load %arg11[%c0_43, %c0_44, %c0_45] : memref<1x1x32xf32, #tpu.memory_space<vmem>>, vector<1x1x32xf32>
    %77 = vector.shape_cast %76 : vector<1x1x32xf32> to vector<1x32xf32>
    %c0_46 = arith.constant 0 : index
    %c0_47 = arith.constant 0 : index
    %c0_48 = arith.constant 0 : index
    %78 = vector.load %arg12[%c0_46, %c0_47, %c0_48] : memref<1x1x32xf32, #tpu.memory_space<vmem>>, vector<1x1x32xf32>
    %79 = vector.shape_cast %78 : vector<1x1x32xf32> to vector<1x32xf32>
    %cst_49 = arith.constant dense<0.000000e+00> : vector<8xf32>
    %80 = vector.multi_reduction <add>, %75, %cst_49 [1] : vector<8x32xf32> to vector<8xf32>
    %81 = vector.shape_cast %80 : vector<8xf32> to vector<8x1xf32>
    %cst_50 = arith.constant 3.200000e+01 : f32
    %82 = vector.broadcast %cst_50 : f32 to vector<8x1xf32>
    %83 = arith.divf %81, %82 : vector<8x1xf32>
    %84 = vector.broadcast %83 : vector<8x1xf32> to vector<8x32xf32>
    %85 = arith.subf %75, %84 : vector<8x32xf32>
    %86 = arith.mulf %85, %85 : vector<8x32xf32>
    %cst_51 = arith.constant dense<0.000000e+00> : vector<8xf32>
    %87 = vector.multi_reduction <add>, %86, %cst_51 [1] : vector<8x32xf32> to vector<8xf32>
    %88 = vector.shape_cast %87 : vector<8xf32> to vector<8x1xf32>
    %cst_52 = arith.constant 3.200000e+01 : f32
    %89 = vector.broadcast %cst_52 : f32 to vector<8x1xf32>
    %90 = arith.divf %88, %89 : vector<8x1xf32>
    %91 = vector.broadcast %83 : vector<8x1xf32> to vector<8x32xf32>
    %92 = arith.subf %75, %91 : vector<8x32xf32>
    %cst_53 = arith.constant 9.99999974E-6 : f32
    %93 = vector.broadcast %cst_53 : f32 to vector<8x1xf32>
    %94 = arith.addf %90, %93 : vector<8x1xf32>
    %95 = math.rsqrt %94 : vector<8x1xf32>
    %96 = vector.broadcast %95 : vector<8x1xf32> to vector<8x32xf32>
    %97 = arith.mulf %92, %96 : vector<8x32xf32>
    %98 = vector.broadcast %77 : vector<1x32xf32> to vector<8x32xf32>
    %99 = arith.mulf %97, %98 : vector<8x32xf32>
    %100 = vector.broadcast %79 : vector<1x32xf32> to vector<8x32xf32>
    %101 = arith.addf %99, %100 : vector<8x32xf32>
    %102 = arith.truncf %101 : vector<8x32xf32> to vector<8x32xbf16>
    %c0_54 = arith.constant 0 : index
    %c0_55 = arith.constant 0 : index
    %c0_56 = arith.constant 0 : index
    %103 = vector.load %arg13[%c0_54, %c0_55, %c0_56] : memref<1x32x128xbf16, #tpu.memory_space<vmem>>, vector<1x32x128xbf16>
    %104 = vector.shape_cast %103 : vector<1x32x128xbf16> to vector<32x128xbf16>
    %cst_57 = arith.constant dense<0.000000e+00> : vector<8x128xf32>
    %105 = tpu.matmul %102, %104, %cst_57 {dimension_numbers = #tpu.dot_dimension_numbers<[1], [0], [0], [1], [0, 0, 1, 1], [], []>} : vector<8x32xbf16>, vector<32x128xbf16>, vector<8x128xf32> -> vector<8x128xf32>
    %c0_58 = arith.constant 0 : index
    %c0_59 = arith.constant 0 : index
    %c0_60 = arith.constant 0 : index
    %106 = vector.load %arg14[%c0_58, %c0_59, %c0_60] : memref<1x1x128xf32, #tpu.memory_space<vmem>>, vector<1x1x128xf32>
    %107 = vector.shape_cast %106 : vector<1x1x128xf32> to vector<1x128xf32>
    %108 = vector.broadcast %107 : vector<1x128xf32> to vector<8x128xf32>
    %109 = arith.addf %105, %108 : vector<8x128xf32>
    %cst_61 = arith.constant 5.000000e-01 : f32
    %110 = vector.broadcast %cst_61 : f32 to vector<8x128xf32>
    %111 = arith.mulf %110, %109 : vector<8x128xf32>
    %cst_62 = arith.constant 4.471500e-02 : f32
    %112 = vector.broadcast %cst_62 : f32 to vector<8x128xf32>
    %113 = arith.mulf %112, %109 : vector<8x128xf32>
    %114 = arith.mulf %113, %109 : vector<8x128xf32>
    %115 = arith.mulf %114, %109 : vector<8x128xf32>
    %116 = arith.addf %109, %115 : vector<8x128xf32>
    %cst_63 = arith.constant 0.797884583 : f32
    %117 = vector.broadcast %cst_63 : f32 to vector<8x128xf32>
    %118 = arith.mulf %117, %116 : vector<8x128xf32>
    %119 = math.tanh %118 : vector<8x128xf32>
    %cst_64 = arith.constant 1.000000e+00 : f32
    %120 = vector.broadcast %cst_64 : f32 to vector<8x128xf32>
    %121 = arith.addf %120, %119 : vector<8x128xf32>
    %122 = arith.mulf %111, %121 : vector<8x128xf32>
    %123 = arith.truncf %122 : vector<8x128xf32> to vector<8x128xbf16>
    %c0_65 = arith.constant 0 : index
    %c0_66 = arith.constant 0 : index
    %c0_67 = arith.constant 0 : index
    %124 = vector.load %arg15[%c0_65, %c0_66, %c0_67] : memref<1x128x32xbf16, #tpu.memory_space<vmem>>, vector<1x128x32xbf16>
    %125 = vector.shape_cast %124 : vector<1x128x32xbf16> to vector<128x32xbf16>
    %cst_68 = arith.constant dense<0.000000e+00> : vector<8x32xf32>
    %126 = tpu.matmul %123, %125, %cst_68 {dimension_numbers = #tpu.dot_dimension_numbers<[1], [0], [0], [1], [0, 0, 1, 1], [], []>} : vector<8x128xbf16>, vector<128x32xbf16>, vector<8x32xf32> -> vector<8x32xf32>
    %c0_69 = arith.constant 0 : index
    %c0_70 = arith.constant 0 : index
    %c0_71 = arith.constant 0 : index
    %127 = vector.load %arg16[%c0_69, %c0_70, %c0_71] : memref<1x1x32xf32, #tpu.memory_space<vmem>>, vector<1x1x32xf32>
    %128 = vector.shape_cast %127 : vector<1x1x32xf32> to vector<1x32xf32>
    %129 = vector.broadcast %128 : vector<1x32xf32> to vector<8x32xf32>
    %130 = arith.addf %126, %129 : vector<8x32xf32>
    %131 = arith.addf %101, %130 : vector<8x32xf32>
    %c0_72 = arith.constant 0 : index
    %c0_73 = arith.constant 0 : index
    %c0_74 = arith.constant 0 : index
    %132 = vector.load %arg17[%c0_72, %c0_73, %c0_74] : memref<1x1x32xf32, #tpu.memory_space<vmem>>, vector<1x1x32xf32>
    %133 = vector.shape_cast %132 : vector<1x1x32xf32> to vector<1x32xf32>
    %c0_75 = arith.constant 0 : index
    %c0_76 = arith.constant 0 : index
    %c0_77 = arith.constant 0 : index
    %134 = vector.load %arg18[%c0_75, %c0_76, %c0_77] : memref<1x1x32xf32, #tpu.memory_space<vmem>>, vector<1x1x32xf32>
    %135 = vector.shape_cast %134 : vector<1x1x32xf32> to vector<1x32xf32>
    %cst_78 = arith.constant dense<0.000000e+00> : vector<8xf32>
    %136 = vector.multi_reduction <add>, %131, %cst_78 [1] : vector<8x32xf32> to vector<8xf32>
    %137 = vector.shape_cast %136 : vector<8xf32> to vector<8x1xf32>
    %cst_79 = arith.constant 3.200000e+01 : f32
    %138 = vector.broadcast %cst_79 : f32 to vector<8x1xf32>
    %139 = arith.divf %137, %138 : vector<8x1xf32>
    %140 = vector.broadcast %139 : vector<8x1xf32> to vector<8x32xf32>
    %141 = arith.subf %131, %140 : vector<8x32xf32>
    %142 = arith.mulf %141, %141 : vector<8x32xf32>
    %cst_80 = arith.constant dense<0.000000e+00> : vector<8xf32>
    %143 = vector.multi_reduction <add>, %142, %cst_80 [1] : vector<8x32xf32> to vector<8xf32>
    %144 = vector.shape_cast %143 : vector<8xf32> to vector<8x1xf32>
    %cst_81 = arith.constant 3.200000e+01 : f32
    %145 = vector.broadcast %cst_81 : f32 to vector<8x1xf32>
    %146 = arith.divf %144, %145 : vector<8x1xf32>
    %147 = vector.broadcast %139 : vector<8x1xf32> to vector<8x32xf32>
    %148 = arith.subf %131, %147 : vector<8x32xf32>
    %cst_82 = arith.constant 9.99999974E-6 : f32
    %149 = vector.broadcast %cst_82 : f32 to vector<8x1xf32>
    %150 = arith.addf %146, %149 : vector<8x1xf32>
    %151 = math.rsqrt %150 : vector<8x1xf32>
    %152 = vector.broadcast %151 : vector<8x1xf32> to vector<8x32xf32>
    %153 = arith.mulf %148, %152 : vector<8x32xf32>
    %154 = vector.broadcast %133 : vector<1x32xf32> to vector<8x32xf32>
    %155 = arith.mulf %153, %154 : vector<8x32xf32>
    %156 = vector.broadcast %135 : vector<1x32xf32> to vector<8x32xf32>
    %157 = arith.addf %155, %156 : vector<8x32xf32>
    %c0_83 = arith.constant 0 : index
    %c0_84 = arith.constant 0 : index
    %c0_85 = arith.constant 0 : index
    %158 = vector.load %arg20[%c0_83, %c0_84, %c0_85] : memref<1x8x32xf32, #tpu.memory_space<vmem>>, vector<1x8x32xf32>
    %159 = vector.shape_cast %158 : vector<1x8x32xf32> to vector<8x32xf32>
    %160 = vector.shape_cast %157 : vector<8x32xf32> to vector<1x8x32xf32>
    tpu.vector_store %arg20[%c0_83, %c0_84, %c0_85], %160 {strides = array<i32>} : memref<1x8x32xf32, #tpu.memory_space<vmem>>, vector<1x8x32xf32>,
    %c1_i32 = arith.constant 1 : i32
    %161 = arith.cmpi eq, %arg1, %c1_i32 : i32
    %162 = arith.extui %161 : i1 to i32
    %c0_i32_86 = arith.constant 0 : i32
    %163 = arith.cmpi ne, %162, %c0_i32_86 : i32
    scf.if %163 {
      %c0_87 = arith.constant 0 : index
      %c0_88 = arith.constant 0 : index
      %c0_89 = arith.constant 0 : index
      %164 = vector.load %arg19[%c0_87, %c0_88, %c0_89] : memref<1x8x32xf32, #tpu.memory_space<vmem>>, vector<1x8x32xf32>
      %165 = vector.shape_cast %164 : vector<1x8x32xf32> to vector<8x32xf32>
      %166 = vector.shape_cast %157 : vector<8x32xf32> to vector<1x8x32xf32>
      tpu.vector_store %arg19[%c0_87, %c0_88, %c0_89], %166 {strides = array<i32>} : memref<1x8x32xf32, #tpu.memory_space<vmem>>, vector<1x8x32xf32>,
    } else {
    }
    return
  }
  func.func @transform_0(%arg0: i32, %arg1: i32) -> (i32, i32, i32) {
    %c0_i32 = arith.constant 0 : i32
    %c0_i32_0 = arith.constant 0 : i32
    %c0_i32_1 = arith.constant 0 : i32
    return %arg0, %c0_i32, %c0_i32_0 : i32, i32, i32
  }
  func.func @transform_1(%arg0: i32, %arg1: i32) -> (i32, i32, i32) {
    %c0_i32 = arith.constant 0 : i32
    %c0_i32_0 = arith.constant 0 : i32
    %c0_i32_1 = arith.constant 0 : i32
    return %arg1, %c0_i32, %c0_i32_0 : i32, i32, i32
  }
  func.func @transform_2(%arg0: i32, %arg1: i32) -> (i32, i32, i32) {
    %c0_i32 = arith.constant 0 : i32
    %c0_i32_0 = arith.constant 0 : i32
    %c0_i32_1 = arith.constant 0 : i32
    return %arg1, %c0_i32, %c0_i32_0 : i32, i32, i32
  }
  func.func @transform_3(%arg0: i32, %arg1: i32) -> (i32, i32, i32) {
    %c0_i32 = arith.constant 0 : i32
    %c0_i32_0 = arith.constant 0 : i32
    %c0_i32_1 = arith.constant 0 : i32
    return %arg1, %c0_i32, %c0_i32_0 : i32, i32, i32
  }
  func.func @transform_4(%arg0: i32, %arg1: i32) -> (i32, i32, i32) {
    %c0_i32 = arith.constant 0 : i32
    %c0_i32_0 = arith.constant 0 : i32
    %c0_i32_1 = arith.constant 0 : i32
    return %arg1, %c0_i32, %c0_i32_0 : i32, i32, i32
  }
  func.func @transform_5(%arg0: i32, %arg1: i32) -> (i32, i32, i32) {
    %c0_i32 = arith.constant 0 : i32
    %c0_i32_0 = arith.constant 0 : i32
    %c0_i32_1 = arith.constant 0 : i32
    return %arg1, %c0_i32, %c0_i32_0 : i32, i32, i32
  }
  func.func @transform_6(%arg0: i32, %arg1: i32) -> (i32, i32, i32) {
    %c0_i32 = arith.constant 0 : i32
    %c0_i32_0 = arith.constant 0 : i32
    %c0_i32_1 = arith.constant 0 : i32
    return %arg1, %c0_i32, %c0_i32_0 : i32, i32, i32
  }
  func.func @transform_7(%arg0: i32, %arg1: i32) -> (i32, i32, i32) {
    %c0_i32 = arith.constant 0 : i32
    %c0_i32_0 = arith.constant 0 : i32
    %c0_i32_1 = arith.constant 0 : i32
    return %arg1, %c0_i32, %c0_i32_0 : i32, i32, i32
  }
  func.func @transform_8(%arg0: i32, %arg1: i32) -> (i32, i32, i32) {
    %c0_i32 = arith.constant 0 : i32
    %c0_i32_0 = arith.constant 0 : i32
    %c0_i32_1 = arith.constant 0 : i32
    return %arg1, %c0_i32, %c0_i32_0 : i32, i32, i32
  }
  func.func @transform_9(%arg0: i32, %arg1: i32) -> (i32, i32, i32) {
    %c0_i32 = arith.constant 0 : i32
    %c0_i32_0 = arith.constant 0 : i32
    %c0_i32_1 = arith.constant 0 : i32
    return %arg1, %c0_i32, %c0_i32_0 : i32, i32, i32
  }
  func.func @transform_10(%arg0: i32, %arg1: i32) -> (i32, i32, i32) {
    %c0_i32 = arith.constant 0 : i32
    %c0_i32_0 = arith.constant 0 : i32
    %c0_i32_1 = arith.constant 0 : i32
    return %arg1, %c0_i32, %c0_i32_0 : i32, i32, i32
  }
  func.func @transform_11(%arg0: i32, %arg1: i32) -> (i32, i32, i32) {
    %c0_i32 = arith.constant 0 : i32
    %c0_i32_0 = arith.constant 0 : i32
    %c0_i32_1 = arith.constant 0 : i32
    return %arg1, %c0_i32, %c0_i32_0 : i32, i32, i32
  }
  func.func @transform_12(%arg0: i32, %arg1: i32) -> (i32, i32, i32) {
    %c0_i32 = arith.constant 0 : i32
    %c0_i32_0 = arith.constant 0 : i32
    %c0_i32_1 = arith.constant 0 : i32
    return %arg1, %c0_i32, %c0_i32_0 : i32, i32, i32
  }
  func.func @transform_13(%arg0: i32, %arg1: i32) -> (i32, i32, i32) {
    %c0_i32 = arith.constant 0 : i32
    %c0_i32_0 = arith.constant 0 : i32
    %c0_i32_1 = arith.constant 0 : i32
    return %arg1, %c0_i32, %c0_i32_0 : i32, i32, i32
  }
  func.func @transform_14(%arg0: i32, %arg1: i32) -> (i32, i32, i32) {
    %c0_i32 = arith.constant 0 : i32
    %c0_i32_0 = arith.constant 0 : i32
    %c0_i32_1 = arith.constant 0 : i32
    return %arg1, %c0_i32, %c0_i32_0 : i32, i32, i32
  }
  func.func @transform_15(%arg0: i32, %arg1: i32) -> (i32, i32, i32) {
    %c0_i32 = arith.constant 0 : i32
    %c0_i32_0 = arith.constant 0 : i32
    %c0_i32_1 = arith.constant 0 : i32
    return %arg1, %c0_i32, %c0_i32_0 : i32, i32, i32
  }
  func.func @transform_16(%arg0: i32, %arg1: i32) -> (i32, i32, i32) {
    %c0_i32 = arith.constant 0 : i32
    %c0_i32_0 = arith.constant 0 : i32
    %c0_i32_1 = arith.constant 0 : i32
    return %arg1, %c0_i32, %c0_i32_0 : i32, i32, i32
  }
  func.func @transform_17(%arg0: i32, %arg1: i32) -> (i32, i32, i32) {
    %c0_i32 = arith.constant 0 : i32
    %c0_i32_0 = arith.constant 0 : i32
    %c0_i32_1 = arith.constant 0 : i32
    return %arg0, %c0_i32, %c0_i32_0 : i32, i32, i32
  }
}

</mosaic_0001>

<bundles_post_ra>
// kernel: splatflow_gpt_forward.3
= control target key start
LH: loop header
LB: loop body
LE: loop exit
PB: predicated region body
PF: predicated region fallthrough
CT: control target
= control target key end

     0   :  { %vm27_vm0 = vcmask 261120   ;;  %s390_s0 = inlined_call_operand.vmem [shape: f32[16,32], index: 0, kind: input, shape index: {}]   ;;  %s391_s1 = inlined_call_operand.vmem [shape: f32[1,32], index: 1, kind: input, shape index: {}]   ;;  %s392_s2 = inlined_call_operand.vmem [shape: f32[1,32], index: 2, kind: input, shape index: {}]   ;;  %s393_s3 = inlined_call_operand.vmem [shape: bf16[128,32], index: 3, kind: input, shape index: {}]   ;;  %s394_s4 = inlined_call_operand.hbm [shape: f32[16,128], index: 4, kind: output, shape index: {}]  }
   0x1   :  { %v23_v0 = vld [vmem:[%s390_s0] sm:$0xff]  ;;  %v24_v1 = vld [vmem:[%s390_s0 + $0x8] sm:$0xff] }
   0x2   :  { %v28_v2 = vsel %vm27_vm0, %v23_v0, 0.0  ;;  %v31_v3 = vsel %vm27_vm0, %v24_v1, 0.0 }
   0x3   :  { %29 = vadd.xlane.f32.xlu0 %v28_v2 }
   0x7   :  { %32 = vadd.xlane.f32.xlu0 %v31_v3 }
   0x8   :  { %9 = vsyncpa [#allocation4], 0  ;;  %v262_v4 = vld [vmem:[%s393_s3] sm:$0xff]   ;;  %v298_v5 = vmov 0.0   ;;  %v263_v7 = vld [vmem:[%s393_s3 + $0x8] sm:$0xff]   ;;  %vm299_vm1 = vmmov 0  }
   0x9   :  { %237 = vmatprep.subr.bf16.mxu0 %v298_v5  ;;  %v135_v6 = vsel %vm27_vm0, %v262_v4, 0  ;;  %v138_v8 = vsel %vm27_vm0, %v263_v7, 0  ;;  %v264_v9 = vld [vmem:[%s393_s3 + $0x10] sm:$0xff]   ;;  %v265_v11 = vld [vmem:[%s393_s3 + $0x18] sm:$0xff]   ;;  %v266_v23 = vld [vmem:[%s393_s3 + $0x20] sm:$0xff]   ;;  %253 = vmatprep.mubr.msk.bf16.mxu0 %vm299_vm1, %v298_v5  ;;  %s300_s11 = smov [#allocation3]  }
   0xa   :  { %238 = vmatpush3.bf16.xpose.msra.mxu0 %v135_v6  ;;  %v141_v10 = vsel %vm27_vm0, %v264_v9, 0  ;;  %v144_v12 = vsel %vm27_vm0, %v265_v11, 0  ;;  %v147_v24 = vsel %vm27_vm0, %v266_v23, 0  ;;  %v267_v25 = vld [vmem:[%s393_s3 + $0x28] sm:$0xff]   ;;  %v268_v27 = vld [vmem:[%s393_s3 + $0x30] sm:$0xff]   ;;  %v269_v29 = vld [vmem:[%s393_s3 + $0x38] sm:$0xff]  }
   0xb   :  { %239 = vmatprep.subr.bf16.mxu0 %v298_v5  ;;  %v150_v26 = vsel %vm27_vm0, %v267_v25, 0  ;;  %v153_v28 = vsel %vm27_vm0, %v268_v27, 0  ;;  %v156_v30 = vsel %vm27_vm0, %v269_v29, 0  ;;  %v217_v39 = vld [vmem:[%s391_s1] ss:$0 sm:$0xff]  ;;  %s206_s12 = sshll.u32 %s300_s11, 4  ;;  %s207_s12 = int_to_ptr.vmem [resolvable:$true] %s206_s12 }
   0xc   :  { %v218_v43 = vld [vmem:[%s392_s2] ss:$0 sm:$0xff]  ;;  %s274_s1 = scalar_lea.vmem %s207_s12, 256  ;;  %p279_p1 = scmp.lt.s32.totalorder %s207_s12, %s207_s12 }
   0xd   :  { %p275_p0 = scmp.ne.s32.totalorder %s207_s12, %s274_s1  ;;  %p280_p2 = scmp.lt.s32.totalorder %s274_s1, %s274_s1 }
   0xf   :  { %p281_p3 = por %p280_p2, %p279_p1 }
  0x11   :  { %p282_p4 = pnand %p281_p3, %p275_p0 }
  0x12   :  { %240 = vmatpush3.bf16.xpose.msra.mxu0 %v138_v8 }
  0x13   :  { %241 = vmatprep.subr.bf16.mxu0 %v298_v5 }
  0x1a   :  { %242 = vmatpush3.bf16.xpose.msra.mxu0 %v141_v10 }
  0x1b   :  { %243 = vmatprep.subr.bf16.mxu0 %v298_v5 }
  0x22   :  { %244 = vmatpush3.bf16.xpose.msra.mxu0 %v144_v12 }
  0x23   :  { %245 = vmatprep.subr.bf16.mxu0 %v298_v5 }
  0x2a   :  { %246 = vmatpush3.bf16.xpose.msra.mxu0 %v147_v24 }
  0x2b   :  { %247 = vmatprep.subr.bf16.mxu0 %v298_v5 }
  0x32   :  { %248 = vmatpush3.bf16.xpose.msra.mxu0 %v150_v26 }
  0x33   :  { %249 = vmatprep.subr.bf16.mxu0 %v298_v5 }
  0x3a   :  { %250 = vmatpush3.bf16.xpose.msra.mxu0 %v153_v28 }
  0x3b   :  { %251 = vmatprep.subr.bf16.mxu0 %v298_v5 }
  0x42   :  { %252 = vmatpush3.bf16.xpose.msra.mxu0 %v156_v30 }
  0x90   :  { %v30_v13 = vpop.xlane.xlu0 %29 }
  0x91   :  { %v35_v14 = vmul.f32 0.03125, %v30_v13 }
  0x93   :  { %v37_v15 = vsub.f32 %v23_v0, %v35_v14 }
  0x94   :  { %v33_v16 = vpop.xlane.xlu0 %32 }
  0x95   :  { %v36_v17 = vmul.f32 0.03125, %v33_v16  ;;  %v39_v18 = vmul.f32 %v37_v15, %v37_v15 }
  0x97   :  { %v38_v19 = vsub.f32 %v24_v1, %v36_v17  ;;  %v41_v20 = vsel %vm27_vm0, %v39_v18, 0.0 }
  0x98   :  { %42 = vadd.xlane.f32.xlu1 %v41_v20 }
  0x99   :  { %v40_v21 = vmul.f32 %v38_v19, %v38_v19 }
  0x9b   :  { %v44_v22 = vsel %vm27_vm0, %v40_v21, 0.0 }
  0x9c   :  { %45 = vadd.xlane.f32.xlu1 %v44_v22 }
 0x125   :  { %v43_v31 = vpop.xlane.xlu1 %42 }
 0x126   :  { %v47_v32 = vmul.f32 0.03125, %v43_v31 }
 0x128   :  { %v49_v33 = vadd.f32 1e-05, %v47_v32 }
 0x129   :  { %v46_v34 = vpop.xlane.xlu1 %45 }
 0x12a   :  { %270 = vrsqrt.f32 %v49_v33  ;;  %v48_v35 = vmul.f32 0.03125, %v46_v34 }
 0x12c   :  { %v50_v36 = vadd.f32 1e-05, %v48_v35 }
 0x12e   :  { %272 = vrsqrt.f32 %v50_v36 }
 0x134   :  { %v271_v37 = vpop.eup %270 }
 0x135   :  { %v53_v38 = vmul.f32 %v271_v37, %v37_v15 }
 0x137   :  { %v61_v41 = vmul.f32 %v217_v39, %v53_v38 }
 0x138   :  { %v273_v40 = vpop.eup %272 }
 0x139   :  { %v54_v42 = vmul.f32 %v273_v40, %v38_v19  ;;  %v69_v45 = vadd.f32 %v218_v43, %v61_v41 }
 0x13b   :  { %v62_v44 = vmul.f32 %v217_v39, %v54_v42 }
 0x13d   :  { %v70_v46 = vadd.f32 %v218_v43, %v62_v44 }
 0x13f   :  { %v71_v47 = vpack.c.bf16 %v70_v46, %v69_v45 }
 0x141   :  { %72 = vst.msk [vmem:[#allocation2] sm:$0xff] %vm27_vm0, %v71_v47 }
 0x148   :  { %v73_v48 = vld [vmem:[#allocation2] sm:$0xff] }
 0x149   :  { %254 = vmatmul.mubr.msk.bf16.vlgmr.msra.gmra.mrb[0].mxu0 %vm27_vm0, %v73_v48 }
 0x21c   :  { %v192_v49 = vpop.f32.mrb[0].mxu0 }
 0x21d   :  { %199 = vst [vmem:[#allocation3] sm:$0xff] %v192_v49  ;;  %v255_v50 = vpop.f32.mrb[1].mxu0 }
 0x21e   :  { %v195_v51 = vpop.f32.mrb[2].mxu0 }
 0x21f   :  { %200 = vst [vmem:[#allocation3 + $0x8] sm:$0xff] %v195_v51  ;;  %v256_v52 = vpop.f32.mrb[3].mxu0 }
 0x220   :  { %285 = shalt.err (!%p282_p4)
}
 0x221   :  { %s286_s14 = scalar_lea.hbm %s394_s4, 256 }
 0x222   :  { %p287_p5 = scmp.ne.s32.totalorder %s394_s4, %s286_s14  ;;  %p290_p6 = scmp.lt.u32.totalorder %s286_s14, %s394_s4 }
 0x224   :  { %p292_p7 = pnand %p290_p6, %p287_p5 }
 0x226   :  { %295 = shalt.err (!%p292_p7)
}
 0x227   :  { %s301_s19 = smov 128   ;;  %s302_s20 = smov 8  }
 0x228   :  { %212 = dma.vmem_to_hbm [thread:$0]  %s207_s12, 256, %s394_s4, [#allocation4], %s301_s19, %s301_s19, %s302_s20  }
 0x229   :  { %296 = dma.done.wait [#allocation4], 256  }
 0x22a   :  { %297 = vsyncadd [#allocation4], 4294967040 }
 0x22b   :  { %216 = vsyncpa [#allocation4], 1 }

// kernel: splatflow_gpt_forward.2
= control target key start
LH: loop header
LB: loop body
LE: loop exit
PB: predicated region body
PF: predicated region fallthrough
CT: control target
= control target key end

     0   :  { %s3535_s0 = inlined_call_operand.vmem [shape: f32[2,8,32], index: 0, kind: input, shape index: {}]   ;;  %s3536_s1 = inlined_call_operand.vmem [shape: bf16[2,32,128], index: 1, kind: input, shape index: {}]   ;;  %s3537_s2 = inlined_call_operand.vmem [shape: f32[2,1,128], index: 2, kind: input, shape index: {}]   ;;  %s3538_s3 = inlined_call_operand.vmem [shape: f32[2,128,128], index: 3, kind: input, shape index: {}]   ;;  %s3539_s4 = inlined_call_operand.vmem [shape: f32[2,1,128], index: 4, kind: input, shape index: {}]   ;;  %s3540_s5 = inlined_call_operand.vmem [shape: bf16[2,32,32], index: 5, kind: input, shape index: {}]   ;;  %s3541_s6 = inlined_call_operand.vmem [shape: f32[2,1,32], index: 6, kind: input, shape index: {}]   ;;  %s3542_s7 = inlined_call_operand.vmem [shape: bf16[2,32,32], index: 7, kind: input, shape index: {}]   ;;  %s3543_s8 = inlined_call_operand.vmem [shape: f32[2,1,32], index: 8, kind: input, shape index: {}]   ;;  %s3544_s9 = inlined_call_operand.hbm [shape: f32[2,1,32], index: 9, kind: input, shape index: {}]   ;;  %s3545_s10 = inlined_call_operand.hbm [shape: f32[2,1,32], index: 10, kind: input, shape index: {}]   ;;  %s3546_s11 = inlined_call_operand.hbm [shape: bf16[2,32,128], index: 11, kind: input, shape index: {}]   ;;  %s3547_s12 = inlined_call_operand.hbm [shape: f32[2,1,128], index: 12, kind: input, shape index: {}]   ;;  %s3548_s13 = inlined_call_operand.vmem [shape: bf16[2,128,32], index: 13, kind: input, shape index: {}]   ;;  %s3549_s14 = inlined_call_operand.hbm [shape: f32[2,1,32], index: 14, kind: input, shape index: {}]   ;;  %s3550_s15 = inlined_call_operand.hbm [shape: f32[2,1,32], index: 15, kind: input, shape index: {}]   ;;  %s3551_s16 = inlined_call_operand.hbm [shape: f32[2,1,32], index: 16, kind: input, shape index: {}]   ;;  %s3552_s17 = inlined_call_operand.vmem [shape: f32[2,8,32], index: 17, kind: output, shape index: {}]  }
   0x1   :  { %3565 = sst [smem:[#allocation27_spill]] %s3535_s0 }
   0x2   :  { %3566 = sst [smem:[#allocation28_spill]] %s3536_s1 }
   0x3   :  { %3567 = sst [smem:[#allocation29_spill]] %s3538_s3 }
   0x4   :  { %3568 = sst [smem:[#allocation30_spill]] %s3540_s5 }
   0x5   :  { %3569 = sst [smem:[#allocation31_spill]] %s3541_s6 }
   0x6   :  { %3570 = sst [smem:[#allocation32_spill]] %s3542_s7 }
   0x7   :  { %3571 = sst [smem:[#allocation33_spill]] %s3543_s8 }
   0x8   :  { %3572 = sst [smem:[#allocation34_spill]] %s3544_s9 }
   0x9   :  { %3573 = sst [smem:[#allocation35_spill]] %s3545_s10 }
   0xa   :  { %3574 = sst [smem:[#allocation36_spill]] %s3546_s11 }
   0xb   :  { %3575 = sst [smem:[#allocation37_spill]] %s3547_s12 }
   0xc   :  { %3576 = sst [smem:[#allocation38_spill]] %s3548_s13 }
   0xd   :  { %3577 = sst [smem:[#allocation39_spill]] %s3549_s14 }
   0xe   :  { %3578 = sst [smem:[#allocation40_spill]] %s3550_s15 }
   0xf   :  { %3579 = sst [smem:[#allocation41_spill]] %s3551_s16 }
  0x10   :  { %3580 = sst [smem:[#allocation42_spill]] %s3552_s17 }
  0x11   :  { %22 = vsyncpa [#allocation4], 0 }
  0x12   :  { %24 = vsyncpa [#allocation4 + $0x1], 0 }
  0x13   :  { %25 = vsyncpa [#allocation6], 0 }
  0x14   :  { %27 = vsyncpa [#allocation6 + $0x1], 0 }
  0x15   :  { %28 = vsyncpa [#allocation9], 0 }
  0x16   :  { %30 = vsyncpa [#allocation9 + $0x1], 0 }
  0x17   :  { %31 = vsyncpa [#allocation12], 0 }
  0x18   :  { %33 = vsyncpa [#allocation12 + $0x1], 0  ;;  %s2992_s24 = smov 0   ;;  %s2994_s25 = smov 0  }
  0x19   :  { %s2996_s26 = smov 0   ;;  %s2998_s27 = smov 0  }
  0x1a   :  { %s3000_s28 = smov 0   ;;  %s3002_s29 = smov 0  }
  0x1b   :  { %s3004_s0 = smov 0   ;;  %s3006_s30 = smov 0  }
  0x1c LB: > { %3581 = sst [smem:[#allocation18_spill]] %s2863_s25  ;;  %s3555_s18 = sadd.s32 4294967295, %s2887_s30   ;;  %s2887_s30 = sphi %s3006_s30, %s39_s30   ;;  %s2883_s0 = sphi %s3004_s0, %s3644_s0   ;;  %s2879_s29 = sphi %s3002_s29, %s3643_s29   ;;  %s2875_s28 = sphi %s3000_s28, %s3642_s28   ;;  %s2871_s27 = sphi %s2998_s27, %s3641_s27   ;;  %s2867_s26 = sphi %s2996_s26, %s3640_s26   ;;  %s2863_s25 = sphi %s2994_s25, %s3639_s25   ;;  %s2859_s24 = sphi %s2992_s24, %s3638_s24  }
  0x1d   : > { %3582 = sst [smem:[#allocation19_spill]] %s2867_s26  ;;  %s48_s19 = sadd.s32 1, %s2879_s29 }
  0x1e   : > { %3583 = sst [smem:[#allocation20_spill]] %s2879_s29  ;;  %p49_p0 = scmp.ge.s32.totalorder %s48_s19, 2 }
  0x1f   : > { %3584 = sst [smem:[#allocation21_spill]] %s2883_s0  ;;  %s51_s1 = sadd.s32 1, %s2883_s0 }
  0x20   : > { %3585 = sst [smem:[#allocation22_spill]] %s2887_s30  ;;  %s292_s20 = sadd.s32 1, %s2867_s26 }
  0x21   : > { %p299_p1 = scmp.ne.s32.totalorder %s2867_s26, %s2863_s25  ;;  %s3646_s19 = smov (%p49_p0, %s48_s19), 0 }
  0x22   : > { %3586 = sst [smem:[#allocation23_spill]] %s3646_s19  ;;  %s3648_s1 = smov (!%p49_p0, %s51_s1), %s2883_s0 }
  0x23   : > { %s289_s21 = ssub.s32 %s2879_s29, %s3646_s19  ;;  %p300_p2 = scmp.eq.s32.totalorder %s2887_s30, 0 }
  0x24   : > { %p53_p3 = scmp.ge.s32.totalorder %s3648_s1, 2  ;;  %p290_p4 = scmp.eq.s32.totalorder %s289_s21, 0 }
  0x25   : > { %p301_p5 = por %p300_p2, %p299_p1  ;;  %p305_p6 = scmp.ne.s32.totalorder %s2863_s25, %s2859_s24 }
  0x26   : > { %s3650_s1 = smov (%p53_p3, %s3648_s1), 0  ;;  %p306_p7 = scmp.eq.s32.totalorder %s3555_s18, 0 }
  0x27   : > { %3587 = sst [smem:[#allocation24_spill]] %s3650_s1  ;;  %p2497_p8 = scmp.lt.s32.totalorder %s2887_s30, 4 }
  0x28   : > { %s3046_s22 = scalar_select %p290_p4, %s2867_s26, %s292_s20  }
  0x29   : > { %s3052_s23 = sand.u32 1, %s2867_s26   ;;  %p3054_p9 = por %p306_p7, %p305_p6 }
  0x2a   : > { %3588 = sst [smem:[#allocation25_spill]] %s3046_s22  ;;  %s3059_s19 = sshll.u32 %s2879_s29, 4 }
  0x2b   : > { %s3589_s0 = scalar_select %p3054_p9, 1, 0 }
  0x2c   : > { %p3061_p10 = pnand %p2497_p8, %p301_p5  ;;  %s3066_s24 = sand.u32 1, %s2887_s30  }
  0x2d   : > { %s3591_s10 = sld [smem:[#allocation35_spill]]  ;;  %s620_s22 = scalar_lea.vmem [#allocation5], %s3052_s23 }
  0x2e   : > { %s3590_s21 = scalar_select %p3061_p10, 1, 0 }
  0x2f   : > { %s627_s26 = sshll.u32 %s620_s22, 4  ;;  %p3084_p0 = pneg %p3061_p10  ;;  %s3076_s26 = int_to_ptr.vmem [resolvable:$true] %s627_s26 }
  0x33   : > { %s3072_s1 = scalar_lea.hbm %s3591_s10, %s3059_s19  ;;  %s2604_s22 = scalar_lea.hbm %s3591_s10, 32 }
  0x34   : > { %s2599_s13 = scalar_lea.hbm %s3072_s1, 16  ;;  %p2605_p3 = scmp.lt.u32.totalorder %s3072_s1, %s3591_s10 }
  0x35   : > { %p2600_p13 = scmp.ne.s32.totalorder %s3072_s1, %s2599_s13  ;;  %p2606_p4 = scmp.lt.u32.totalorder %s2604_s22, %s2599_s13 }
  0x36   : > { %p2608_p6 = scmp.lt.u32.totalorder %s2599_s13, %s3072_s1 }
  0x37   : > { %p2602_p1 = pnand %p3084_p0, %p2600_p13  ;;  %p2607_p5 = por %p2606_p4, %p2605_p3 }
  0x39   : > { %p2603_p2 = pneg %p2602_p1  ;;  %p2609_p7 = por %p2608_p6, %p2607_p5 }
  0x3b   : > { %p2610_p8 = pnand %p2609_p7, %p2603_p2 }
  0x3d   : > { %2613 = shalt.err (!%p2610_p8)
}
  0x3e   : > { %s2614_s17 = scalar_lea.vmem %s3076_s26, 16  ;;  %s2889_s18 = smov [#allocation5]  }
  0x3f   : > { %p2615_p13 = scmp.ne.s32.totalorder %s3076_s26, %s2614_s17  ;;  %s2619_s20 = sshll.u32 %s2889_s18, 4  ;;  %s2620_s20 = int_to_ptr.vmem [resolvable:$false] %s2619_s20 }
  0x40   : > { %s2621_s6 = scalar_lea.vmem %s2620_s20, 32  ;;  %p2622_p12 = scmp.lt.s32.totalorder %s3076_s26, %s2620_s20 }
  0x41   : > { %p2617_p1 = pnand %p2615_p13, %p3084_p0  ;;  %p2623_p9 = scmp.lt.s32.totalorder %s2621_s6, %s2614_s17 }
  0x43   : > { %p2618_p11 = pneg %p2617_p1  ;;  %p2624_p3 = por %p2623_p9, %p2622_p12 }
  0x45   : > { %p2625_p4 = pnand %p2624_p3, %p2618_p11 }
  0x47   : > { %2628 = shalt.err (!%p2625_p4)
}
  0x48   : > { %s3593_s7 = scalar_lea.sflag [#allocation6], %s3066_s24  ;;  %p3594_p2 = scmp.lt.s32.totalorder %s2887_s30, 5 }
  0x49   : > { %2481 = dma.hbm_to_vmem [thread:$0]  (!%p3061_p10), %s3072_s1, 16, %s3076_s26, %s3593_s7  }
  0x4a   : > { %p3595_p5 = scmp.ge.s32.totalorder %s2887_s30, 1  ;;  %s3597_s12 = sld [smem:[#allocation37_spill]] }
  0x4b   : > { %s658_s20 = scalar_lea.vmem [#allocation8], %s3052_s23 }
  0x4c   : > { %p3113_p6 = pnand %p3595_p5, %p3594_p2  ;;  %s665_s6 = sshll.u32 %s658_s20, 4  ;;  %s666_s6 = int_to_ptr.vmem [resolvable:$true] %s665_s6 }
  0x4e   : > { %s3596_s13 = scalar_select %p3113_p6, 1, 0 }
  0x50   : > { %s3121_s18 = scalar_lea.hbm %s3597_s12, %s3059_s19  ;;  %s2634_s5 = scalar_lea.hbm %s3597_s12, 32 }
  0x51   : > { %s2629_s26 = scalar_lea.hbm %s3121_s18, 16  ;;  %p2635_p7 = scmp.lt.u32.totalorder %s3121_s18, %s3597_s12 }
  0x52   : > { %p2630_p9 = scmp.ne.s32.totalorder %s3121_s18, %s2629_s26  ;;  %p2636_p8 = scmp.lt.u32.totalorder %s2634_s5, %s2629_s26 }
  0x53   : > { %p2638_p1 = scmp.lt.u32.totalorder %s2629_s26, %s3121_s18 }
  0x54   : > { %p2632_p11 = pnand %p2630_p9, %p3084_p0  ;;  %p2637_p13 = por %p2636_p8, %p2635_p7 }
  0x56   : > { %p2633_p12 = pneg %p2632_p11  ;;  %p2639_p3 = por %p2638_p1, %p2637_p13 }
  0x58   : > { %p2640_p4 = pnand %p2639_p3, %p2633_p12 }
  0x5a   : > { %2643 = shalt.err (!%p2640_p4)
}
  0x5b   : > { %s2644_s20 = scalar_lea.vmem %s666_s6, 16  ;;  %s2890_s10 = smov [#allocation8]  }
  0x5c   : > { %p2645_p2 = scmp.ne.s32.totalorder %s666_s6, %s2644_s20  ;;  %s2649_s3 = sshll.u32 %s2890_s10, 4  ;;  %s2650_s3 = int_to_ptr.vmem [resolvable:$false] %s2649_s3 }
  0x5d   : > { %s2651_s1 = scalar_lea.vmem %s2650_s3, 32  ;;  %p2652_p11 = scmp.lt.s32.totalorder %s666_s6, %s2650_s3 }
  0x5e   : > { %p2647_p5 = pnand %p2645_p2, %p3084_p0  ;;  %p2653_p6 = scmp.lt.s32.totalorder %s2651_s1, %s2644_s20 }
  0x60   : > { %p2648_p9 = pneg %p2647_p5  ;;  %p2654_p10 = por %p2653_p6, %p2652_p11 }
  0x62   : > { %p2655_p7 = pnand %p2654_p10, %p2648_p9 }
  0x64   : > { %2658 = shalt.err (!%p2655_p7)
}
  0x65   : > { %p3598_p8 = scmp.ne.s32.totalorder %s3590_s21, 0  ;;  %s3599_s5 = scalar_lea.sflag [#allocation9], %s3066_s24 }
  0x66   : > { %s3600_s15 = sld [smem:[#allocation40_spill]]  ;;  %s700_s3 = scalar_lea.vmem [#allocation11], %s3052_s23 }
  0x67   : > { %2487 = dma.hbm_to_vmem [thread:$0]  (!%p3598_p8), %s3121_s18, 16, %s666_s6, %s3599_s5  }
  0x68   : > { %s707_s17 = sshll.u32 %s700_s3, 4  ;;  %s708_s17 = int_to_ptr.vmem [resolvable:$true] %s707_s17 }
  0x6c   : > { %s3148_s10 = scalar_lea.hbm %s3600_s15, %s3059_s19  ;;  %s2664_s6 = scalar_lea.hbm %s3600_s15, 32 }
  0x6d   : > { %s2659_s20 = scalar_lea.hbm %s3148_s10, 16  ;;  %p2665_p13 = scmp.lt.u32.totalorder %s3148_s10, %s3600_s15 }
  0x6e   : > { %p2660_p10 = scmp.ne.s32.totalorder %s3148_s10, %s2659_s20  ;;  %p2666_p1 = scmp.lt.u32.totalorder %s2664_s6, %s2659_s20 }
  0x6f   : > { %p2668_p4 = scmp.lt.u32.totalorder %s2659_s20, %s3148_s10 }
  0x70   : > { %p2662_p6 = pnand %p2660_p10, %p3084_p0  ;;  %p2667_p3 = por %p2666_p1, %p2665_p13 }
  0x72   : > { %p2663_p12 = pneg %p2662_p6  ;;  %p2669_p2 = por %p2668_p4, %p2667_p3 }
  0x74   : > { %p2670_p5 = pnand %p2669_p2, %p2663_p12 }
  0x76   : > { %2673 = shalt.err (!%p2670_p5)
}
  0x77   : > { %s2674_s7 = scalar_lea.vmem %s708_s17, 16  ;;  %s2891_s3 = smov [#allocation11]  }
  0x78   : > { %p2675_p9 = scmp.ne.s32.totalorder %s708_s17, %s2674_s7  ;;  %s2679_s22 = sshll.u32 %s2891_s3, 4  ;;  %s2680_s22 = int_to_ptr.vmem [resolvable:$false] %s2679_s22 }
  0x79   : > { %s2681_s1 = scalar_lea.vmem %s2680_s22, 32  ;;  %p2682_p10 = scmp.lt.s32.totalorder %s708_s17, %s2680_s22 }
  0x7a   : > { %p2677_p11 = pnand %p2675_p9, %p3084_p0  ;;  %p2683_p6 = scmp.lt.s32.totalorder %s2681_s1, %s2674_s7 }
  0x7c   : > { %p2678_p7 = pneg %p2677_p11  ;;  %p2684_p8 = por %p2683_p6, %p2682_p10 }
  0x7e   : > { %p2685_p1 = pnand %p2684_p8, %p2678_p7 }
  0x80   : > { %2688 = shalt.err (!%p2685_p1)
}
  0x81   : > { %p3601_p13 = scmp.ne.s32.totalorder %s3590_s21, 0  ;;  %s3602_s20 = scalar_lea.sflag [#allocation12], %s3066_s24 }
  0x82   : > { %s3603_s9 = sld [smem:[#allocation34_spill]]  ;;  %s603_s22 = scalar_lea.vmem [#allocation3], %s3052_s23 }
  0x83   : > { %2493 = dma.hbm_to_vmem [thread:$0]  (!%p3601_p13), %s3148_s10, 16, %s708_s17, %s3602_s20  }
  0x84   : > { %s610_s26 = sshll.u32 %s603_s22, 4  ;;  %s601_s3 = scalar_lea.sflag [#allocation4], %s3052_s23  ;;  %s611_s26 = int_to_ptr.vmem [resolvable:$true] %s610_s26 }
  0x88   : > { %s3175_s5 = scalar_lea.hbm %s3603_s9, %s3059_s19  ;;  %s2694_s20 = scalar_lea.hbm %s3603_s9, 32 }
  0x89   : > { %s2689_s1 = scalar_lea.hbm %s3175_s5, 16  ;;  %p2695_p4 = scmp.lt.u32.totalorder %s3175_s5, %s3603_s9 }
  0x8a   : > { %p2690_p8 = scmp.ne.s32.totalorder %s3175_s5, %s2689_s1  ;;  %p2696_p2 = scmp.lt.u32.totalorder %s2694_s20, %s2689_s1 }
  0x8b   : > { %p2698_p9 = scmp.lt.u32.totalorder %s2689_s1, %s3175_s5 }
  0x8c   : > { %p2692_p12 = pnand %p2690_p8, %p3084_p0  ;;  %p2697_p5 = por %p2696_p2, %p2695_p4 }
  0x8e   : > { %p2693_p3 = pneg %p2692_p12  ;;  %p2699_p11 = por %p2698_p9, %p2697_p5 }
  0x90   : > { %p2700_p7 = pnand %p2699_p11, %p2693_p3 }
  0x92   : > { %2703 = shalt.err (!%p2700_p7)
}
  0x93   : > { %s2704_s22 = scalar_lea.vmem %s611_s26, 16  ;;  %s2892_s7 = smov [#allocation3]  }
  0x94   : > { %p2705_p10 = scmp.ne.s32.totalorder %s611_s26, %s2704_s22  ;;  %s2709_s12 = sshll.u32 %s2892_s7, 4  ;;  %s2710_s12 = int_to_ptr.vmem [resolvable:$false] %s2709_s12 }
  0x95   : > { %s2711_s10 = scalar_lea.vmem %s2710_s12, 32  ;;  %p2712_p8 = scmp.lt.s32.totalorder %s611_s26, %s2710_s12 }
  0x96   : > { %p2707_p6 = pnand %p2705_p10, %p3084_p0  ;;  %p2713_p12 = scmp.lt.s32.totalorder %s2711_s10, %s2704_s22 }
  0x98   : > { %p2708_p1 = pneg %p2707_p6  ;;  %p2714_p13 = por %p2713_p12, %p2712_p8 }
  0x9a   : > { %p2715_p2 = pnand %p2714_p13, %p2708_p1 }
  0x9c   : > { %2718 = shalt.err (!%p2715_p2)
}
  0x9d   : > { %p3604_p4 = scmp.ne.s32.totalorder %s3590_s21, 0  ;;  %s2173_s1 = sshll.u32 %s2879_s29, 8 }
  0x9e   : > { %s3605_s17 = sshll.u32 %s3052_s23, 4  ;;  %s3606_s11 = sld [smem:[#allocation36_spill]] }
  0x9f   : > { %2478 = dma.hbm_to_vmem [thread:$0]  (!%p3604_p4), %s3175_s5, 16, %s611_s26, %s601_s3  }
  0xa0   : > { %s638_s20 = scalar_lea.vmem [#allocation7], %s3605_s17 }
  0xa1   : > { %s645_s18 = sshll.u32 %s638_s20, 4  ;;  %s3205_s18 = int_to_ptr.vmem [resolvable:$true] %s645_s18 }
  0xa4   : > { %s3203_s9 = scalar_lea.hbm %s3606_s11, %s2173_s1  ;;  %s2724_s3 = scalar_lea.hbm %s3606_s11, 512 }
  0xa5   : > { %s2719_s12 = scalar_lea.hbm %s3203_s9, 256  ;;  %p2725_p9 = scmp.lt.u32.totalorder %s3203_s9, %s3606_s11 }
  0xa6   : > { %p2720_p13 = scmp.ne.s32.totalorder %s3203_s9, %s2719_s12  ;;  %p2726_p11 = scmp.lt.u32.totalorder %s2724_s3, %s2719_s12 }
  0xa7   : > { %p2728_p10 = scmp.lt.u32.totalorder %s2719_s12, %s3203_s9 }
  0xa8   : > { %p2722_p3 = pnand %p2720_p13, %p3084_p0  ;;  %p2727_p7 = por %p2726_p11, %p2725_p9 }
  0xaa   : > { %p2723_p5 = pneg %p2722_p3  ;;  %p2729_p6 = por %p2728_p10, %p2727_p7 }
  0xac   : > { %p2730_p1 = pnand %p2729_p6, %p2723_p5 }
  0xae   : > { %2733 = shalt.err (!%p2730_p1)
}
  0xaf   : > { %s2734_s1 = scalar_lea.vmem %s3205_s18, 256  ;;  %s2893_s17 = smov [#allocation7]  }
  0xb0   : > { %p2735_p8 = scmp.ne.s32.totalorder %s3205_s18, %s2734_s1  ;;  %s2739_s20 = sshll.u32 %s2893_s17, 4  ;;  %s2740_s20 = int_to_ptr.vmem [resolvable:$false] %s2739_s20 }
  0xb1   : > { %s2741_s6 = scalar_lea.vmem %s2740_s20, 512  ;;  %p2742_p13 = scmp.lt.s32.totalorder %s3205_s18, %s2740_s20 }
  0xb2   : > { %p2737_p12 = pnand %p2735_p8, %p3084_p0  ;;  %p2743_p3 = scmp.lt.s32.totalorder %s2741_s6, %s2734_s1 }
  0xb4   : > { %p2738_p2 = pneg %p2737_p12  ;;  %p2744_p9 = por %p2743_p3, %p2742_p13 }
  0xb6   : > { %p2745_p11 = pnand %p2744_p9, %p2738_p2 }
  0xb8   : > { %2748 = shalt.err (!%p2745_p11)
}
  0xb9   : > { %s2894_s7 = smov 64   ;;  %s2895_s12 = smov 4  }
  0xba   : > { %s3607_s5 = scalar_lea.sflag [#allocation6], %s3066_s24  ;;  %s3608_s14 = sld [smem:[#allocation39_spill]] }
  0xbb   : > { %2484 = dma.hbm_to_vmem [thread:$0]  (!%p3604_p4), %s3203_s9, 256, %s3205_s18, %s3607_s5, %s2894_s7, %s2894_s7, %s2895_s12  }
  0xbc   : > { %s683_s10 = scalar_lea.vmem [#allocation10], %s3052_s23  ;;  %s3609_s16 = sld [smem:[#allocation41_spill]] }
  0xbd   : > { %s690_s1 = sshll.u32 %s683_s10, 4  ;;  %s691_s1 = int_to_ptr.vmem [resolvable:$true] %s690_s1 }
  0xc0   : > { %s3234_s22 = scalar_lea.hbm %s3608_s14, %s3059_s19  ;;  %s2754_s7 = scalar_lea.hbm %s3608_s14, 32 }
  0xc1   : > { %s2749_s11 = scalar_lea.hbm %s3234_s22, 16  ;;  %p2755_p6 = scmp.lt.u32.totalorder %s3234_s22, %s3608_s14 }
  0xc2   : > { %s3241_s6 = scalar_lea.hbm %s3609_s16, %s3059_s19  ;;  %p2750_p5 = scmp.ne.s32.totalorder %s3234_s22, %s2749_s11 }
  0xc3   : > { %p2756_p1 = scmp.lt.u32.totalorder %s2754_s7, %s2749_s11  ;;  %p2758_p12 = scmp.lt.u32.totalorder %s2749_s11, %s3234_s22 }
  0xc4   : > { %p2752_p7 = pnand %p2750_p5, %p3084_p0 }
  0xc5   : > { %p2757_p8 = por %p2756_p1, %p2755_p6 }
  0xc6   : > { %p2753_p10 = pneg %p2752_p7 }
  0xc7   : > { %p2759_p2 = por %p2758_p12, %p2757_p8 }
  0xc9   : > { %p2760_p13 = pnand %p2759_p2, %p2753_p10 }
  0xcb   : > { %2763 = shalt.err (!%p2760_p13)
}
  0xcc   : > { %s2764_s19 = scalar_lea.vmem %s691_s1, 16  ;;  %s2896_s26 = smov [#allocation10]  }
  0xcd   : > { %p2765_p3 = scmp.ne.s32.totalorder %s691_s1, %s2764_s19  ;;  %s2769_s3 = sshll.u32 %s2896_s26, 4  ;;  %s2770_s3 = int_to_ptr.vmem [resolvable:$false] %s2769_s3 }
  0xce   : > { %s2771_s10 = scalar_lea.vmem %s2770_s3, 32  ;;  %p2772_p5 = scmp.lt.s32.totalorder %s691_s1, %s2770_s3 }
  0xcf   : > { %p2767_p9 = pnand %p2765_p3, %p3084_p0  ;;  %p2773_p7 = scmp.lt.s32.totalorder %s2771_s10, %s2764_s19 }
  0xd1   : > { %p2768_p11 = pneg %p2767_p9  ;;  %p2774_p4 = por %p2773_p7, %p2772_p5 }
  0xd3   : > { %p2775_p1 = pnand %p2774_p4, %p2768_p11 }
  0xd5   : > { %2778 = shalt.err (!%p2775_p1)
}
  0xd6   : > { %p3610_p6 = scmp.ne.s32.totalorder %s3590_s21, 0  ;;  %s3611_s11 = scalar_lea.sflag [#allocation9], %s3066_s24 }
  0xd7   : > { %s717_s17 = scalar_lea.vmem [#allocation13], %s3052_s23  ;;  %s2779_s9 = scalar_lea.hbm %s3241_s6, 16 }
  0xd8   : > { %2490 = dma.hbm_to_vmem [thread:$0]  (!%p3610_p6), %s3234_s22, 16, %s691_s1, %s3611_s11  }
  0xd9   : > { %s724_s20 = sshll.u32 %s717_s17, 4  ;;  %p2780_p10 = scmp.ne.s32.totalorder %s3241_s6, %s2779_s9  ;;  %s725_s20 = int_to_ptr.vmem [resolvable:$true] %s724_s20 }
  0xda   : > { %s2784_s12 = scalar_lea.hbm %s3609_s16, 32  ;;  %p2785_p12 = scmp.lt.u32.totalorder %s3241_s6, %s3609_s16 }
  0xdb   : > { %p2782_p4 = pnand %p2780_p10, %p3084_p0  ;;  %p2786_p2 = scmp.lt.u32.totalorder %s2784_s12, %s2779_s9 }
  0xdc   : > { %p2788_p3 = scmp.lt.u32.totalorder %s2779_s9, %s3241_s6 }
  0xdd   : > { %p2783_p8 = pneg %p2782_p4  ;;  %p2787_p13 = por %p2786_p2, %p2785_p12 }
  0xdf   : > { %p2789_p9 = por %p2788_p3, %p2787_p13 }
  0xe1   : > { %p2790_p11 = pnand %p2789_p9, %p2783_p8 }
  0xe3   : > { %2793 = shalt.err (!%p2790_p11)
}
  0xe4   : > { %s2794_s23 = scalar_lea.vmem %s725_s20, 16  ;;  %s2897_s22 = smov [#allocation13]  }
  0xe5   : > { %p2795_p5 = scmp.ne.s32.totalorder %s725_s20, %s2794_s23  ;;  %s2799_s1 = sshll.u32 %s2897_s22, 4  ;;  %s2800_s1 = int_to_ptr.vmem [resolvable:$false] %s2799_s1 }
  0xe6   : > { %s2801_s26 = scalar_lea.vmem %s2800_s1, 32  ;;  %p2802_p10 = scmp.lt.s32.totalorder %s725_s20, %s2800_s1 }
  0xe7   : > { %p2797_p7 = pnand %p2795_p5, %p3084_p0  ;;  %p2803_p4 = scmp.lt.s32.totalorder %s2801_s26, %s2794_s23 }
  0xe9   : > { %p2798_p1 = pneg %p2797_p7  ;;  %p2804_p6 = por %p2803_p4, %p2802_p10 }
  0xeb   : > { %p2805_p2 = pnand %p2804_p6, %p2798_p1 }
  0xed   : > { %2808 = shalt.err (!%p2805_p2)
}
  0xee   : > { %p3612_p12 = scmp.ne.s32.totalorder %s3590_s21, 0  ;;  %s3613_s3 = scalar_lea.sflag [#allocation12], %s3066_s24 }
  0xef   : > { %p3614_p8 = scmp.ne.s32.totalorder %s3596_s13, 0 }
  0xf0   : > { %2496 = dma.hbm_to_vmem [thread:$0]  (!%p3612_p12), %s3241_s6, 16, %s725_s20, %s3613_s3  }
  0xf1   : > { %733 = sbr.rel (%p3614_p8) target bundleno = 2773 (0xad5), region = 88 }
  0xf8   : > { %s3285_s8 = sand.u32 1, %s2863_s25   ;;  %p3615_p0 = scmp.ne.s32.totalorder %s3589_s0, 0 }
  0xf9   : > { %s736_s10 = scalar_lea.sflag [#allocation4], %s3285_s8 }
  0xfa   : > { %2842 = dma.done.wait (%p3615_p0), %s736_s10, 16  }
  0xfb   : > { %2844 = vsyncadd (%p3615_p0), %s736_s10, 4294967280  ;;  %s3616_s21 = sadd.s32 4294967295, %s2887_s30  }
  0xfc   : > { %s743_s24 = sand.u32 1, %s3616_s21  }
  0xfd   : > { %s744_s13 = scalar_lea.sflag [#allocation6], %s743_s24 }
  0xfe   : > { %2846 = dma.done.wait (%p3615_p0), %s744_s13, 272  }
  0xff   : > { %2848 = vsyncadd (%p3615_p0), %s744_s13, 4294967024  ;;  %s2119_s17 = sshll.u32 %s3285_s8, 4  ;;  %s761_s9 = scalar_lea.sflag [#allocation9], %s743_s24 }
 0x100   : > { %s3301_s20 = scalar_lea.vmem [#allocation7], %s2119_s17 }
 0x101   : > { %3617 = sst [smem:[#allocation26_spill]] %s3301_s20 }
 0x102   : > { %2850 = dma.done.wait (%p3615_p0), %s761_s9, 32  }
 0x103   : > { %2852 = vsyncadd (%p3615_p0), %s761_s9, 4294967264  ;;  %s777_s12 = scalar_lea.sflag [#allocation12], %s743_s24 }
 0x104   : > { %2854 = dma.done.wait (%p3615_p0), %s777_s12, 32  }
 0x105   : > { %2856 = vsyncadd (%p3615_p0), %s777_s12, 4294967264  ;;  %p902_p6 = scmp.lt.s32.totalorder %s2875_s28, 1  ;;  %p906_p13 = scmp.lt.s32.totalorder %s2871_s27, 1 }
 0x106   : > { %s3618_s1 = sld [smem:[#allocation27_spill]]  ;;  %s3619_s24 = sld [smem:[#allocation28_spill]] }
 0x107   : > { %s3652_s28 = smov (!%p902_p6, %s2875_s28), 1  ;;  %s3620_s14 = sld [smem:[#allocation29_spill]] }
 0x108   : > { %s3318_s19 = scalar_select %p906_p13, %s2871_s27, 1 }
 0x109   : > { %s2120_s23 = sshll.u32 %s3652_s28, 3  ;;  %s3623_s12 = sld [smem:[#allocation32_spill]] }
 0x10a   : > { %s2174_s3 = sshll.u32 %s3318_s19, 4  ;;  %s2175_s5 = sshll.u32 %s3318_s19, 7 }
 0x10b   : > { %s3624_s6 = sld [smem:[#allocation33_spill]]  ;;  %s2178_s11 = sshll.u32 %s3318_s19, 6 }
 0x10c   : > { %s905_s26 = scalar_lea.vmem %s3618_s1, %s2120_s23  ;;  %s910_s13 = scalar_lea.vmem %s3619_s24, %s2174_s3 }
 0x10d   : > { %s3339_s15 = scalar_lea.vmem %s3620_s14, %s2175_s5  ;;  %s3621_s1 = sld [smem:[#allocation30_spill]] }
 0x10e   : > { %s3622_s24 = sld [smem:[#allocation31_spill]]  ;;  %s3625_s28 = sld [smem:[#allocation38_spill]] }
 0x10f   : > { %s3351_s25 = scalar_lea.vmem %s3623_s12, %s2174_s3  ;;  %s787_s21 = scalar_lea.vmem [#allocation13], %s3285_s8 }
 0x110   : > { %p2132_p3 = scmp.ne.s32.totalorder %s2871_s27, 0 }
 0x111   : > { %s937_s30 = scalar_lea.vmem %s3624_s6, %s3318_s19  ;;  %v952_v0 = vld [vmem:[%s905_s26] sm:$0xff] (!%p2132_p3)  ;;  %vm953_vm0 = vcmask (!%p2132_p3), 261120  }
 0x112   : > { %954 = vst.msk [vmem:[#allocation2] sm:$0xff] (!%p2132_p3), %vm953_vm0, %v952_v0 }
 0x113   : > { %s926_s16 = scalar_lea.vmem %s3621_s1, %s2174_s3  ;;  %s3626_s1 = sld [smem:[#allocation42_spill]] }
 0x114   : > { %s929_s29 = scalar_lea.vmem %s3622_s24, %s3318_s19  ;;  %s3361_s20 = scalar_lea.vmem %s3625_s28, %s2178_s11 }
 0x115   : > { %951 = sbr.rel (%p2132_p3) target bundleno = 284 (0x11c), region = 120 }
 0x119   : > { %s3366_s10 = scalar_lea.vmem %s3626_s1, %s2120_s23 }
 0x11c PF: > { %v2569_v1 = vld [vmem:[%s910_s13] sm:$0xff]   ;;  %v2898_v2 = vmov 0.0   ;;  %v2570_v3 = vld [vmem:[%s910_s13 + $0x8] sm:$0xff]   ;;  %vm2899_vm1 = vmmov 0   ;;  %vm980_vm2 = vcmask 261120   ;;  %v2900_v10 = vmov 0.0|0.0   ;;  %s3627_s6 = scalar_lea.vmem %s3537_s2, %s3318_s19  ;;  %s3629_s24 = scalar_lea.vmem %s3539_s4, %s3318_s19 }
 0x11d   : > { %2252 = vmatprep.subr.bf16.mxu0 %v2898_v2  ;;  %2260 = vmatprep.subr.bf16.mxu1 %v2898_v2  ;;  %v3374_v4 = vld [vmem:[#allocation2] sm:$0xff]  ;;  %v1088_v7 = vld [vmem:[%s3339_s15 + $0x8] sm:$0xff]  ;;  %v1089_v13 = vld [vmem:[%s3339_s15 + $0x10] sm:$0xff]  ;;  %v2901_v57 = vmov 1.0   ;;  %vm1339_vm3 = vcmask 1043456   ;;  %vm1314_vm5 = vcmask 64512  }
 0x11e   : > { %2253 = vmatpush3.bf16.msra.mxu0 %v2569_v1  ;;  %2256 = vmatprep.mubr.msk.bf16.mxu0 %vm2899_vm1, %v2898_v2  ;;  %v2571_v5 = vld [vmem:[%s926_s16] sm:$0xff]   ;;  %v956_v8 = vpack.c.bf16 %v3374_v4, %v3374_v4  ;;  %v2572_v9 = vld [vmem:[%s926_s16 + $0x8] sm:$0xff]   ;;  %v1115_v12 = vmul.f32 %v1088_v7, %v1088_v7  ;;  %v1090_v14 = vld [vmem:[%s3339_s15 + $0x18] sm:$0xff]  ;;  %v1116_v17 = vmul.f32 %v1089_v13, %v1089_v13  ;;  %s3631_s18 = sld [smem:[#allocation26_spill]]  ;;  %s3634_s19 = scalar_lea.vmem [#allocation8], %s3285_s8 }
 0x11f   : > { %2254 = vmatprep.subr.bf16.mxu0 %v2898_v2  ;;  %2264 = vmatprep.mubr.msk.bf16.mxu1 %vm2899_vm1, %v2898_v2  ;;  %v1087_v6 = vld [vmem:[%s3339_s15] sm:$0xff]  ;;  %v1117_v18 = vmul.f32 %v1090_v14, %v1090_v14  ;;  %v1092_v21 = vld [vmem:[%s3339_s15 + $0x28] sm:$0xff]  ;;  %v2440_v22 = vpack.c.bf16 %v1090_v14, %v1089_v13  ;;  %v1093_v26 = vld [vmem:[%s3339_s15 + $0x30] sm:$0xff]  ;;  %s3636_s7 = scalar_lea.vmem [#allocation11], %s3285_s8  ;;  %p2170_p9 = scmp.ne.s32.totalorder %s2871_s27, 1 }
 0x120   : > { %2261 = vmatpush3.bf16.msra.mxu1 %v2571_v5  ;;  %v1114_v11 = vmul.f32 %v1087_v6, %v1087_v6  ;;  %v2437_v16 = vpack.c.bf16 %v1088_v7, %v1087_v6  ;;  %v1091_v20 = vld [vmem:[%s3339_s15 + $0x20] sm:$0xff]  ;;  %v1119_v24 = vmul.f32 %v1092_v21, %v1092_v21  ;;  %v1094_v27 = vld [vmem:[%s3339_s15 + $0x38] sm:$0xff]  ;;  %v1120_v29 = vmul.f32 %v1093_v26, %v1093_v26  ;;  %v1096_v33 = vld [vmem:[%s3339_s15 + $0x48] sm:$0xff] }
 0x121   : > { %2262 = vmatprep.subr.bf16.mxu1 %v2898_v2  ;;  %v2416_v19 = vpack.c.bf16 %v1117_v18, %v1116_v17  ;;  %v1118_v23 = vmul.f32 %v1091_v20, %v1091_v20  ;;  %v2443_v28 = vpack.c.bf16 %v1092_v21, %v1091_v20  ;;  %v1121_v30 = vmul.f32 %v1094_v27, %v1094_v27  ;;  %v1095_v32 = vld [vmem:[%s3339_s15 + $0x40] sm:$0xff]  ;;  %v1097_v38 = vld [vmem:[%s3339_s15 + $0x50] sm:$0xff]  ;;  %v1098_v39 = vld [vmem:[%s3339_s15 + $0x58] sm:$0xff] }
 0x122   : > { %2255 = vmatpush3.bf16.msra.mxu0 %v2570_v3  ;;  %v2413_v15 = vpack.c.bf16 %v1115_v12, %v1114_v11  ;;  %v2446_v34 = vpack.c.bf16 %v1094_v27, %v1093_v26  ;;  %v1122_v35 = vmul.f32 %v1095_v32, %v1095_v32  ;;  %v1123_v36 = vmul.f32 %v1096_v33, %v1096_v33  ;;  %v1099_v44 = vld [vmem:[%s3339_s15 + $0x60] sm:$0xff]  ;;  %v1100_v45 = vld [vmem:[%s3339_s15 + $0x68] sm:$0xff]  ;;  %v1101_v50 = vld [vmem:[%s3339_s15 + $0x70] sm:$0xff] }
 0x123   : > { %2412 = vmatprep.subr.bf16.mxu0 %v2900_v10  ;;  %v2419_v25 = vpack.c.bf16 %v1119_v24, %v1118_v23  ;;  %v2422_v31 = vpack.c.bf16 %v1121_v30, %v1120_v29  ;;  %v2449_v40 = vpack.c.bf16 %v1096_v33, %v1095_v32  ;;  %v1124_v41 = vmul.f32 %v1097_v38, %v1097_v38  ;;  %v1102_v51 = vld [vmem:[%s3339_s15 + $0x78] sm:$0xff]  ;;  %v2133_v58 = vld [vmem:[%s3627_s6] ss:$0 sm:$0xff] }
 0x124   : > { %2263 = vmatpush3.bf16.msra.mxu1 %v2572_v9  ;;  %v2425_v37 = vpack.c.bf16 %v1123_v36, %v1122_v35  ;;  %v1125_v42 = vmul.f32 %v1098_v39, %v1098_v39  ;;  %v2452_v46 = vpack.c.bf16 %v1098_v39, %v1097_v38  ;;  %v1126_v47 = vmul.f32 %v1099_v44, %v1099_v44  ;;  %v2137_v1 = vld [vmem:[%s929_s29] ss:$0 sm:$0xff] }
 0x125   : > { %2257 = vmatmul.mubr.msk.bf16.vlgmr.msra.gmra.mrb[0].mxu0 %vm980_vm2, %v956_v8  ;;  %2436 = vmatprep.subr.bf16.mxu1 %v2900_v10  ;;  %v1127_v48 = vmul.f32 %v1100_v45, %v1100_v45  ;;  %v2455_v52 = vpack.c.bf16 %v1100_v45, %v1099_v44  ;;  %v1128_v53 = vmul.f32 %v1101_v50, %v1101_v50  ;;  %v1103_v13 = vld [vmem:[%s3629_s24] sm:$0x1] }
 0x126   : > { %2300 = vmatprep.mubr.msk.f32.mxu0 %vm2899_vm1, %v2898_v2  ;;  %v2428_v43 = vpack.c.bf16 %v1125_v42, %v1124_v41  ;;  %v1129_v54 = vmul.f32 %v1102_v51, %v1102_v51  ;;  %v2458_v56 = vpack.c.bf16 %v1102_v51, %v1101_v50  ;;  %v1104_v14 = vmul.f32 1.442695, %v1103_v13  ;;  %v2573_v50 = vld [vmem:[%s3351_s25] sm:$0xff]   ;;  %v2574_v13 = vld [vmem:[%s3351_s25 + $0x8] sm:$0xff]   ;;  %s3632_s25 = scalar_lea.vmem [#allocation3], %s3285_s8 }
 0x127   : > { %2265 = vmatmul.mubr.msk.bf16.vlgmr.msra.gmra.mrb[0].mxu1 %vm980_vm2, %v956_v8  ;;  %v2431_v49 = vpack.c.bf16 %v1127_v48, %v1126_v47 }
 0x128   : > { %2335 = vmatprep.mubr.msk.f32.mxu1 %vm2899_vm1, %v2898_v2  ;;  %v2434_v55 = vpack.c.bf16 %v1129_v54, %v1128_v53  ;;  %2585 = vpow2.f32 %v1104_v14 }
 0x12b   : > { %2414 = vmatpush3.bf16.xpose.msra.mxu0 %v2413_v15 }
 0x12c   : > { %2415 = vmatprep.subr.bf16.mxu0 %v2900_v10 }
 0x12d   : > { %2438 = vmatpush3.bf16.xpose.msra.mxu1 %v2437_v16 }
 0x12e   : > { %2439 = vmatprep.subr.bf16.mxu1 %v2900_v10 }
 0x132   : > { %v2586_v15 = vpop.eup %2585 }
 0x133   : > { %2417 = vmatpush3.bf16.xpose.msra.mxu0 %v2416_v19  ;;  %v1106_v16 = vmax.f32 %v2586_v15, 0.1  ;;  %v1272_v19 = vlaneseq }
 0x134   : > { %2418 = vmatprep.subr.bf16.mxu0 %v2900_v10 }
 0x135   : > { %2441 = vmatpush3.bf16.xpose.msra.mxu1 %v2440_v22  ;;  %v1107_v17 = vmin.f32 %v1106_v16, 2.0  ;;  %v1273_v20 = vshrl.u32 %v1272_v19, 7 }
 0x136   : > { %2442 = vmatprep.subr.bf16.mxu1 %v2900_v10 }
 0x137   : > { %v1108_v18 = vmul.f32 %v1107_v17, %v1107_v17  ;;  %v1274_v21 = vsub.s32 0, %v1273_v20 }
 0x139   : > { %2587 = vrcp.f32 %v1108_v18 }
 0x13b   : > { %2420 = vmatpush3.bf16.xpose.msra.mxu0 %v2419_v25 }
 0x13c   : > { %2421 = vmatprep.subr.bf16.mxu0 %v2900_v10 }
 0x13d   : > { %2444 = vmatpush3.bf16.xpose.msra.mxu1 %v2443_v28 }
 0x13e   : > { %2445 = vmatprep.subr.bf16.mxu1 %v2900_v10 }
 0x143   : > { %2423 = vmatpush3.bf16.xpose.msra.mxu0 %v2422_v31  ;;  %v2588_v26 = vpop.eup %2587 }
 0x144   : > { %2424 = vmatprep.subr.bf16.mxu0 %v2900_v10  ;;  %v1282_v30 = vrot.slane %v2588_v26, %v1274_v21 }
 0x145   : > { %2447 = vmatpush3.bf16.xpose.msra.mxu1 %v2446_v34  ;;  %v1288_v34 = vand.u32 127, %v1272_v19  ;;  %v2149_v19 = vld [vmem:[%s937_s30] ss:$0 sm:$0xff]  ;;  %s3633_s30 = scalar_lea.vmem [#allocation5], %s3285_s8 }
 0x146   : > { %2448 = vmatprep.subr.bf16.mxu1 %v2900_v10 }
 0x147   : > { %vm1289_vm4 = vcmp.lt.s32.totalorder %v1288_v34, 4 }
 0x14b   : > { %2426 = vmatpush3.bf16.xpose.msra.mxu0 %v2425_v37 }
 0x14c   : > { %2427 = vmatprep.subr.bf16.mxu0 %v2900_v10 }
 0x14d   : > { %2450 = vmatpush3.bf16.xpose.msra.mxu1 %v2449_v40 }
 0x14e   : > { %2451 = vmatprep.subr.bf16.mxu1 %v2900_v10 }
 0x153   : > { %2429 = vmatpush3.bf16.xpose.msra.mxu0 %v2428_v43 }
 0x154   : > { %2430 = vmatprep.subr.bf16.mxu0 %v2900_v10 }
 0x155   : > { %2453 = vmatpush3.bf16.xpose.msra.mxu1 %v2452_v46 }
 0x156   : > { %2454 = vmatprep.subr.bf16.mxu1 %v2900_v10 }
 0x15b   : > { %2432 = vmatpush3.bf16.xpose.msra.mxu0 %v2431_v49 }
 0x15c   : > { %2433 = vmatprep.subr.bf16.mxu0 %v2900_v10 }
 0x15d   : > { %2456 = vmatpush3.bf16.xpose.msra.mxu1 %v2455_v52 }
 0x15e   : > { %2457 = vmatprep.subr.bf16.mxu1 %v2900_v10 }
 0x163   : > { %2435 = vmatpush3.bf16.xpose.msra.mxu0 %v2434_v55 }
 0x164   : > { %2376 = vmatprep.subr.bf16.mxu0 %v2898_v2 }
 0x165   : > { %2459 = vmatpush3.bf16.xpose.msra.mxu1 %v2458_v56 }
 0x16a   : > { %2301 = vmatmul.mubr.f32.vlgmr.msra.gmra.mrb[4].mxu0 %v2901_v57 }
 0x16b   : > { %2380 = vmatprep.mubr.msk.bf16.mxu0 %vm2899_vm1, %v2898_v2  ;;  %2377 = vmatpush3.bf16.msra.mxu0 %v2573_v50  ;;  %v2584_v50 = vld [vmem:[%s3361_s20 + $0x38] sm:$0xff]  }
 0x16c   : > { %2378 = vmatprep.subr.bf16.mxu0 %v2898_v2 }
 0x16f   : > { %2379 = vmatpush3.bf16.msra.mxu0 %v2574_v13 }
 0x170   : > { %2392 = vmatprep.subr.bf16.mxu0 %v2898_v2 }
 0x1f8   : > { %v1018_v59 = vpop.f32.mrb[0].mxu0 }
 0x1f9   : > { %v1019_v60 = vadd.f32 %v2133_v58, %v1018_v59  ;;  %v2258_v61 = vpop.f32.mrb[1].mxu0 }
 0x1fa   : > { %v1021_v62 = vpop.f32.mrb[2].mxu0  ;;  %v1081_v3 = vpop.f32.mrb[0].mxu1 }
 0x1fb   : > { %v2259_v63 = vpop.f32.mrb[3].mxu0  ;;  %2336 = vmatmul.mubr.f32.vlgmr.msra.gmra.mrb[4].mxu1 %v1019_v60  ;;  %v1111_v0 = vmul.f32 %v1019_v60, %v1019_v60  ;;  %v1082_v5 = vadd.f32 %v2137_v1, %v1081_v3  ;;  %v2266_v6 = vpop.f32.mrb[1].mxu1 }
 0x1fc   : > { %v1084_v7 = vpop.f32.mrb[2].mxu1 }
 0x1fd   : > { %1112 = vadd.xlane.f32.xlu0 %v1111_v0  ;;  %v1297_v8 = vpack.c.bf16 %v1082_v5, %v1082_v5  ;;  %v2267_v9 = vpop.f32.mrb[3].mxu1 }
 0x1ff   : > { %v1341_v10 = vsel %vm1339_vm3, %v1297_v8, 0  ;;  %2460 = vmatprep.subr.msk.bf16.mxu1 %vm1339_vm3, %v1297_v8 }
 0x200   : > { %2339 = vmatpush3.bf16.msra.mxu1 %v1341_v10 }
 0x201   : > { %2356 = vmatprep.subr.bf16.mxu1 %v2898_v2 }
 0x23d   : > { %v1196_v11 = vpop.f32.mrb[4].mxu0 }
 0x23e   : > { %v2302_v12 = vpop.f32.mrb[5].mxu0  ;;  %v1275_v24 = vrot.slane %v1196_v11, %v1274_v21 }
 0x28a   : > { %v1113_v27 = vpop.xlane.xlu0 %1112 }
 0x2ce   : > { %v1266_v22 = vpop.f32.mrb[4].mxu1 }
 0x2cf   : > { %v1270_v23 = vmul.f32 2.0, %v1266_v22  ;;  %v2337_v25 = vpop.f32.mrb[5].mxu1 }
 0x2d1   : > { %v1271_v28 = vsub.f32 %v1113_v27, %v1270_v23 }
 0x2d3   : > { %v1276_v29 = vadd.f32 %v1275_v24, %v1271_v28 }
 0x2d5   : > { %v1277_v31 = vmul.f32 -0.5, %v1276_v29 }
 0x2d7   : > { %v1284_v32 = vmul.f32 %v1282_v30, %v1277_v31 }
 0x2d9   : > { %v1285_v33 = vmul.f32 1.442695, %v1284_v32  ;;  %v2575_v32 = vld [vmem:[%s3631_s18] sm:$0xff]  }
 0x2db   : > { %2589 = vpow2.f32 %v1285_v33  ;;  %v2576_v33 = vld [vmem:[%s3631_s18 + $0x8] sm:$0xff]  }
 0x2e5   : > { %v2590_v35 = vpop.eup %2589 }
 0x2e6   : > { %v1290_v36 = vsel %vm1289_vm4, %v2590_v35, 0.0 }
 0x2e7   : > { %1291 = vadd.xlane.f32.xlu0 %v1290_v36 }
 0x374   : > { %v1292_v37 = vpop.xlane.xlu0 %1291 }
 0x375   : > { %v1293_v38 = vadd.f32 1e-08, %v1292_v37 }
 0x377   : > { %2591 = vrcp.f32 %v1293_v38  ;;  %v2153_v38 = vld [vmem:[%s3632_s25] ss:$0 sm:$0xff] }
 0x381   : > { %v2592_v39 = vpop.eup %2591 }
 0x382   : > { %v1295_v40 = vmul.f32 %v2592_v39, %v1290_v36 }
 0x384   : > { %v1296_v41 = vpack.c.bf16 %v1295_v40, %v1295_v40  ;;  %v2154_v40 = vld [vmem:[%s3633_s30] ss:$0 sm:$0xff] }
 0x386   : > { %1298 = vxpose.xlu1.c.b16.start.end [1/1] (short) %v1296_v41, 128 }
 0x3ec   : > { %v1306_v42 = vpop.trf.xlu1 }
 0x3ed   : > { %2340 = vmatprep.mubr.msk.bf16.mxu1 %vm1314_vm5, %v1306_v42 }
 0x3f0   : > { %v1307_v43 = vpop.trf.xlu1 }
 0x3f1   : > { %2341 = vmatmul.mubr.msk.bf16.vlgmr.msra.gmra.mrb[8].mxu1 %vm1314_vm5, %v1307_v43 }
 0x3f4   : > { %v1308_v44 = vpop.trf.xlu1 }
 0x3f5   : > { %2344 = vmatprep.mubr.msk.bf16.mxu1 %vm1314_vm5, %v1308_v44  ;;  %v2578_v44 = vld [vmem:[%s3361_s20 + $0x8] sm:$0xff]  }
 0x3f8   : > { %v1309_v45 = vpop.trf.xlu1 }
 0x3f9   : > { %2345 = vmatmul.mubr.msk.bf16.gmra.mrb[12].mxu1 %vm1314_vm5, %v1309_v45  ;;  %v2579_v45 = vld [vmem:[%s3361_s20 + $0x10] sm:$0xff]  }
 0x3fc   : > { %v1310_v46 = vpop.trf.xlu1 }
 0x3fd   : > { %2348 = vmatprep.mubr.msk.bf16.mxu1 %vm1314_vm5, %v1310_v46  ;;  %v2580_v46 = vld [vmem:[%s3361_s20 + $0x18] sm:$0xff]  }
 0x400   : > { %v1311_v47 = vpop.trf.xlu1 }
 0x401   : > { %2349 = vmatmul.mubr.msk.bf16.gmra.mrb[16].mxu1 %vm1314_vm5, %v1311_v47  ;;  %v2581_v47 = vld [vmem:[%s3361_s20 + $0x20] sm:$0xff]  }
 0x404   : > { %v1312_v48 = vpop.trf.xlu1 }
 0x405   : > { %2352 = vmatprep.mubr.msk.bf16.mxu1 %vm1314_vm5, %v1312_v48  ;;  %v2582_v48 = vld [vmem:[%s3361_s20 + $0x28] sm:$0xff]  }
 0x408   : > { %v1313_v49 = vpop.trf.xlu1 }
 0x409   : > { %2353 = vmatmul.mubr.msk.bf16.gmra.mrb[20].mxu1 %vm1314_vm5, %v1313_v49  ;;  %v2583_v49 = vld [vmem:[%s3361_s20 + $0x30] sm:$0xff]  }
 0x40a   : > { %2372 = vmatprep.mubr.msk.bf16.mxu1 %vm2899_vm1, %v2898_v2 }
 0x4c4   : > { %v2342_v51 = vpop.f32.mrb[8].mxu1 }
 0x4c5   : > { %v1377_v52 = vpop.f32.mrb[9].mxu1 }
 0x4c6   : > { %v2343_v53 = vpop.f32.mrb[10].mxu1 }
 0x4c7   : > { %v1441_v54 = vpack.c.bf16 %v2343_v53, %v2342_v51  ;;  %v1380_v55 = vpop.f32.mrb[11].mxu1  ;;  %v2155_v51 = vld [vmem:[%s3634_s19] ss:$0 sm:$0xff] }
 0x4c8   : > { %v1440_v56 = vpack.c.bf16 %v1380_v55, %v1377_v52 }
 0x4ca   : > { %2357 = vmatpush3.bf16.msra.mxu1 %v1440_v56 }
 0x4cb   : > { %2358 = vmatprep.subr.bf16.mxu1 %v2898_v2 }
 0x4cc   : > { %v2346_v57 = vpop.f32.mrb[12].mxu1 }
 0x4cd   : > { %v1393_v58 = vpop.f32.mrb[13].mxu1 }
 0x4ce   : > { %v2347_v59 = vpop.f32.mrb[14].mxu1  ;;  %2359 = vmatpush3.bf16.msra.mxu1 %v1441_v54 }
 0x4cf   : > { %v1443_v60 = vpack.c.bf16 %v2347_v59, %v2346_v57  ;;  %v1396_v61 = vpop.f32.mrb[15].mxu1  ;;  %2360 = vmatprep.subr.bf16.mxu1 %v2898_v2 }
 0x4d0   : > { %v1442_v62 = vpack.c.bf16 %v1396_v61, %v1393_v58 }
 0x4d2   : > { %2361 = vmatpush3.bf16.msra.mxu1 %v1442_v62 }
 0x4d3   : > { %2362 = vmatprep.subr.bf16.mxu1 %v2898_v2 }
 0x4d4   : > { %v2350_v63 = vpop.f32.mrb[16].mxu1 }
 0x4d5   : > { %v1409_v0 = vpop.f32.mrb[17].mxu1 }
 0x4d6   : > { %v2351_v1 = vpop.f32.mrb[18].mxu1  ;;  %2363 = vmatpush3.bf16.msra.mxu1 %v1443_v60 }
 0x4d7   : > { %v1445_v3 = vpack.c.bf16 %v2351_v1, %v2350_v63  ;;  %v1412_v5 = vpop.f32.mrb[19].mxu1  ;;  %2364 = vmatprep.subr.bf16.mxu1 %v2898_v2 }
 0x4d8   : > { %v1444_v6 = vpack.c.bf16 %v1412_v5, %v1409_v0 }
 0x4da   : > { %2365 = vmatpush3.bf16.msra.mxu1 %v1444_v6 }
 0x4db   : > { %2366 = vmatprep.subr.bf16.mxu1 %v2898_v2 }
 0x4dc   : > { %v2354_v7 = vpop.f32.mrb[20].mxu1 }
 0x4dd   : > { %v1425_v8 = vpop.f32.mrb[21].mxu1 }
 0x4de   : > { %v2355_v9 = vpop.f32.mrb[22].mxu1  ;;  %2367 = vmatpush3.bf16.msra.mxu1 %v1445_v3 }
 0x4df   : > { %v1447_v10 = vpack.c.bf16 %v2355_v9, %v2354_v7  ;;  %v1428_v11 = vpop.f32.mrb[23].mxu1  ;;  %2368 = vmatprep.subr.bf16.mxu1 %v2898_v2 }
 0x4e0   : > { %v1446_v12 = vpack.c.bf16 %v1428_v11, %v1425_v8 }
 0x4e2   : > { %2369 = vmatpush3.bf16.msra.mxu1 %v1446_v12 }
 0x4e3   : > { %2370 = vmatprep.subr.bf16.mxu1 %v2898_v2 }
 0x4e6   : > { %2371 = vmatpush3.bf16.msra.mxu1 %v1447_v10 }
 0x4e7   : > { %2384 = vmatprep.subr.bf16.mxu1 %v2898_v2 }
 0x4e9   : > { %2373 = vmatmul.mubr.bf16.vlgmr.msra.gmra.mrb[24].mxu1 %v1296_v41 }
 0x4ea   : > { %2388 = vmatprep.mubr.msk.bf16.mxu1 %vm2899_vm1, %v2898_v2  ;;  %2385 = vmatpush3.bf16.msra.mxu1 %v2575_v32 }
 0x4eb   : > { %2386 = vmatprep.subr.bf16.mxu1 %v2898_v2 }
 0x4ee   : > { %2387 = vmatpush3.bf16.msra.mxu1 %v2576_v33 }
 0x5bc   : > { %v1482_v14 = vpop.f32.mrb[24].mxu1 }
 0x5bd   : > { %v1488_v15 = vpack.c.bf16 %v1482_v14, %v1482_v14  ;;  %v2374_v16 = vpop.f32.mrb[25].mxu1 }
 0x5be   : > { %v1485_v17 = vpop.f32.mrb[26].mxu1 }
 0x5bf   : > { %v2375_v18 = vpop.f32.mrb[27].mxu1  ;;  %2381 = vmatmul.mubr.msk.bf16.vlgmr.msra.gmra.mrb[8].mxu0 %vm980_vm2, %v1488_v15 }
 0x5c0   : > { %2408 = vmatprep.mubr.msk.bf16.mxu0 %vm2899_vm1, %v2898_v2 }
 0x692   : > { %v1549_v20 = vpop.f32.mrb[8].mxu0 }
 0x693   : > { %v1550_v21 = vadd.f32 %v2149_v19, %v1549_v20  ;;  %v2382_v22 = vpop.f32.mrb[9].mxu0 }
 0x694   : > { %v1552_v23 = vpop.f32.mrb[10].mxu0 }
 0x695   : > { %v2383_v24 = vpop.f32.mrb[11].mxu0  ;;  %v1555_v25 = vadd.f32 %v1550_v21, %v3374_v4  ;;  %v2577_v4 = vld [vmem:[%s3361_s20] sm:$0xff]   ;;  %s3635_s20 = scalar_lea.vmem [#allocation10], %s3285_s8 }
 0x696   : > { %2393 = vmatpush3.bf16.msra.mxu0 %v2577_v4  ;;  %v2159_v3 = vld [vmem:[%s3635_s20] ss:$0 sm:$0xff] }
 0x697   : > { %v1558_v26 = vsel %vm980_vm2, %v1555_v25, 0.0  ;;  %2394 = vmatprep.subr.bf16.mxu0 %v2898_v2  ;;  %v2168_v21 = vld [vmem:[%s3636_s7] ss:$0 sm:$0xff] }
 0x698   : > { %1559 = vadd.xlane.f32.xlu1 %v1558_v26  ;;  %v2169_v23 = vld [vmem:[%s787_s21] ss:$0 sm:$0xff] }
 0x69a   : > { %2395 = vmatpush3.bf16.msra.mxu0 %v2578_v44 }
 0x69b   : > { %2396 = vmatprep.subr.bf16.mxu0 %v2898_v2 }
 0x69e   : > { %2397 = vmatpush3.bf16.msra.mxu0 %v2579_v45 }
 0x69f   : > { %2398 = vmatprep.subr.bf16.mxu0 %v2898_v2 }
 0x6a2   : > { %2399 = vmatpush3.bf16.msra.mxu0 %v2580_v46 }
 0x6a3   : > { %2400 = vmatprep.subr.bf16.mxu0 %v2898_v2 }
 0x6a6   : > { %2401 = vmatpush3.bf16.msra.mxu0 %v2581_v47 }
 0x6a7   : > { %2402 = vmatprep.subr.bf16.mxu0 %v2898_v2 }
 0x6aa   : > { %2403 = vmatpush3.bf16.msra.mxu0 %v2582_v48 }
 0x6ab   : > { %2404 = vmatprep.subr.bf16.mxu0 %v2898_v2 }
 0x6ae   : > { %2405 = vmatpush3.bf16.msra.mxu0 %v2583_v49 }
 0x6af   : > { %2406 = vmatprep.subr.bf16.mxu0 %v2898_v2 }
 0x6b2   : > { %2407 = vmatpush3.bf16.msra.mxu0 %v2584_v50 }
 0x725   : > { %v1560_v27 = vpop.xlane.xlu1 %1559 }
 0x726   : > { %v1562_v28 = vmul.f32 0.03125, %v1560_v27 }
 0x728   : > { %v1563_v29 = vsub.f32 %v1555_v25, %v1562_v28 }
 0x72a   : > { %v1564_v30 = vmul.f32 %v1563_v29, %v1563_v29 }
 0x72c   : > { %v1565_v31 = vsel %vm980_vm2, %v1564_v30, 0.0 }
 0x72d   : > { %1566 = vadd.xlane.f32.xlu0 %v1565_v31 }
 0x7ba   : > { %v1567_v34 = vpop.xlane.xlu0 %1566 }
 0x7bb   : > { %v1568_v35 = vmul.f32 0.03125, %v1567_v34 }
 0x7bd   : > { %v1569_v36 = vadd.f32 1e-05, %v1568_v35 }
 0x7bf   : > { %2593 = vrsqrt.f32 %v1569_v36 }
 0x7c9   : > { %v2594_v37 = vpop.eup %2593 }
 0x7ca   : > { %v1571_v39 = vmul.f32 %v2594_v37, %v1563_v29 }
 0x7cc   : > { %v1578_v41 = vmul.f32 %v2153_v38, %v1571_v39 }
 0x7ce   : > { %v1585_v42 = vadd.f32 %v2154_v40, %v1578_v41 }
 0x7d0   : > { %v1586_v43 = vpack.c.bf16 %v1585_v42, %v1585_v42 }
 0x7d2   : > { %2389 = vmatmul.mubr.msk.bf16.vlgmr.msra.gmra.mrb[28].mxu1 %vm980_vm2, %v1586_v43 }
 0x8a5   : > { %v1647_v52 = vpop.f32.mrb[28].mxu1 }
 0x8a6   : > { %v1648_v53 = vadd.f32 %v2155_v51, %v1647_v52  ;;  %v2390_v54 = vpop.f32.mrb[29].mxu1 }
 0x8a7   : > { %v1650_v55 = vpop.f32.mrb[30].mxu1 }
 0x8a8   : > { %v1654_v56 = vmul.f32 0.044715, %v1648_v53  ;;  %v2391_v57 = vpop.f32.mrb[31].mxu1  ;;  %v1653_v63 = vmul.f32 0.5, %v1648_v53 }
 0x8aa   : > { %v1655_v58 = vmul.f32 %v1654_v56, %v1648_v53 }
 0x8ac   : > { %v1656_v59 = vmul.f32 %v1655_v58, %v1648_v53 }
 0x8ae   : > { %v1657_v60 = vadd.f32 %v1656_v59, %v1648_v53 }
 0x8b0   : > { %v1658_v61 = vmul.f32 0.7978846, %v1657_v60 }
 0x8b2   : > { %2595 = vtanh.f32 %v1658_v61 }
 0x8bc   : > { %v2596_v62 = vpop.eup %2595 }
 0x8bd   : > { %v1660_v0 = vadd.f32 1.0, %v2596_v62 }
 0x8bf   : > { %v1661_v1 = vmul.f32 %v1660_v0, %v1653_v63 }
 0x8c1   : > { %v1662_v2 = vpack.c.bf16 %v1661_v1, %v1661_v1 }
 0x8c3   : > { %2409 = vmatmul.mubr.bf16.vlgmr.msra.gmra.mrb[12].mxu0 %v1662_v2 }
 0x996   : > { %v1768_v5 = vpop.f32.mrb[12].mxu0 }
 0x997   : > { %v1769_v6 = vadd.f32 %v2159_v3, %v1768_v5  ;;  %v2410_v7 = vpop.f32.mrb[13].mxu0 }
 0x998   : > { %v1771_v8 = vpop.f32.mrb[14].mxu0 }
 0x999   : > { %v2411_v9 = vpop.f32.mrb[15].mxu0  ;;  %v1774_v10 = vadd.f32 %v1769_v6, %v1585_v42 }
 0x99b   : > { %v1777_v11 = vsel %vm980_vm2, %v1774_v10, 0.0 }
 0x99c   : > { %1778 = vadd.xlane.f32.xlu0 %v1777_v11 }
 0xa29   : > { %v1779_v12 = vpop.xlane.xlu0 %1778 }
 0xa2a   : > { %v1780_v13 = vmul.f32 0.03125, %v1779_v12 }
 0xa2c   : > { %v1781_v14 = vsub.f32 %v1774_v10, %v1780_v13 }
 0xa2e   : > { %v1782_v15 = vmul.f32 %v1781_v14, %v1781_v14 }
 0xa30   : > { %v1783_v16 = vsel %vm980_vm2, %v1782_v15, 0.0 }
 0xa31   : > { %1784 = vadd.xlane.f32.xlu0 %v1783_v16 }
 0xabe   : > { %v1785_v17 = vpop.xlane.xlu0 %1784 }
 0xabf   : > { %v1786_v18 = vmul.f32 0.03125, %v1785_v17 }
 0xac1   : > { %v1787_v19 = vadd.f32 1e-05, %v1786_v18 }
 0xac3   : > { %2597 = vrsqrt.f32 %v1787_v19 }
 0xacd   : > { %v2598_v20 = vpop.eup %2597 }
 0xace   : > { %v1789_v22 = vmul.f32 %v2598_v20, %v1781_v14  ;;  %1808 = sbr.rel (%p2170_p9) target bundleno = 2773 (0xad5), region = 124 }
 0xad0   : > { %v1796_v24 = vmul.f32 %v2168_v21, %v1789_v22 }
 0xad2   : > { %v1803_v25 = vadd.f32 %v2169_v23, %v1796_v24 }
 0xad4   : > { %1804 = vst.msk [vmem:[#allocation2] sm:$0xff] %vm980_vm2, %v1803_v25  ;;  %1809 = vst.msk [vmem:[%s3366_s10] sm:$0xff] (!%p2170_p9), %vm980_vm2, %v1803_v25 }
 0xad5 PF: > { %s3637_s11 = sld [smem:[#allocation22_spill]]  ;;  %s3638_s24 = sld [smem:[#allocation18_spill]] }
 0xad6   : > { %s3639_s25 = sld [smem:[#allocation19_spill]]  ;;  %s3640_s26 = sld [smem:[#allocation25_spill]] }
 0xad7   : > { %s3641_s27 = sld [smem:[#allocation20_spill]]  ;;  %s3642_s28 = sld [smem:[#allocation21_spill]] }
 0xad8   : > { %s3643_s29 = sld [smem:[#allocation23_spill]]  ;;  %s3644_s0 = sld [smem:[#allocation24_spill]] }
 0xadb   : > { %s39_s30 = sadd.s32 1, %s3637_s11  }
 0xadc   : > { %p36_p11 = scmp.ge.s32.totalorder %s39_s30, 6  }
 0xade   :  { %38 = sbr.rel (!%p36_p11) target bundleno = 28 (0x1c), region = 238 }
 0xae5   :  { %1829 = vsyncpa [#allocation4], 1 }
 0xae6   :  { %1831 = vsyncpa [#allocation4 + $0x1], 1 }
 0xae7   :  { %1832 = vsyncpa [#allocation6], 1 }
 0xae8   :  { %1834 = vsyncpa [#allocation6 + $0x1], 1 }
 0xae9   :  { %1835 = vsyncpa [#allocation9], 1 }
 0xaea   :  { %1837 = vsyncpa [#allocation9 + $0x1], 1 }
 0xaeb   :  { %1838 = vsyncpa [#allocation12], 1 }
 0xaec   :  { %1840 = vsyncpa [#allocation12 + $0x1], 1 }

</bundles_post_ra>
